<compile_context>
chip_gen: v7x
topology: tpu7x:2x2x1
jax: 0.10.0
libtpu: 0.0.40
codegen_flags: <defaults>
</compile_context>

<pallas_src>
import functools

import numpy as np
import jax
import jax.numpy as jnp
from jax import lax
from jax.experimental import pallas as pl
from jax.experimental.pallas import tpu as pltpu

_PAD = 128  # zero guard lanes on each side of the carried hidden-state row


def _bcrnn_step_kernel(stat_ref, wh_ref, mask_ref, out_ref, h_scr, *, W, HID, N, K):
    """One time step of one sweep direction.

    grid = (2, T): axis 0 = direction (0 fwd, 1 bwd, "parallel"), axis 1 = step ("arbitrary").

    stat_ref : (HID, N)            bf16  i2h(x) + ih2ih(hi) + biases for this direction's frame
    wh_ref   : (K*K, HID, HID)     f32   per-tap h2h weights, wh[tap, cout, cin]
    mask_ref : (K*K, HID, N)       f32   per-tap 0/1 validity masks over output lanes
    out_ref  : (HID, N)            f32   hidden state for this (direction, frame)
    h_scr    : (2, HID, 2*_PAD+N)  f32   carried hidden state per direction, zero guard lanes
    """
    d = pl.program_id(0)
    s = pl.program_id(1)
    p = K // 2

    @pl.when(s == 0)
    def _():
        h_scr[d] = jnp.zeros((HID, 2 * _PAD + N), jnp.float32)

    hrow = h_scr[d]                                    # (HID, 2*_PAD+N) f32
    acc = stat_ref[...].astype(jnp.float32)            # (HID, N) f32

    for ky in range(K):
        for kx in range(K):
            tap = ky * K + kx
            shift = (ky - p) * W + (kx - p)            # lane offset of this conv tap
            start = _PAD + shift
            hs = hrow[:, start:start + N]              # (HID, N) shifted hidden state
            if not (ky == p and kx == p):
                hs = hs * mask_ref[tap, :, :]          # zero out-of-frame contributions
            acc = acc + jnp.dot(wh_ref[tap, :, :], hs,
                                preferred_element_type=jnp.float32)

    new_h = jnp.maximum(acc, 0.0)                      # ReLU, f32
    h_scr[d, :, _PAD:_PAD + N] = new_h                 # carry (guard lanes stay zero)
    out_ref[...] = new_h


def _make_bcrnn_call(T, B, H, W, K, HID):
    N = B * H * W
    KK = K * K
    kernel = functools.partial(_bcrnn_step_kernel, W=W, HID=HID, N=N, K=K)

    def frame(d, s):
        # forward sweep (d=0): frame s ; backward sweep (d=1): frame T-1-s
        return d * (T - 1 - 2 * s) + s

    grid_spec = pltpu.PrefetchScalarGridSpec(
        num_scalar_prefetch=0,
        grid=(2, T),
        in_specs=[
            pl.BlockSpec((None, HID, N), lambda d, s: (frame(d, s), 0, 0)),   # stat (streamed)
            pl.BlockSpec((KK, HID, HID), lambda d, s: (0, 0, 0)),             # h2h weights
            pl.BlockSpec((KK, HID, N), lambda d, s: (0, 0, 0)),               # tap masks
        ],
        out_specs=pl.BlockSpec((None, None, HID, N),
                               lambda d, s: (d, frame(d, s), 0, 0)),
        scratch_shapes=[pltpu.VMEM((2, HID, 2 * _PAD + N), jnp.float32)],
    )
    return pl.pallas_call(
        kernel,
        out_shape=jax.ShapeDtypeStruct((2, T, HID, N), jnp.float32),
        grid_spec=grid_spec,
        compiler_params=pltpu.CompilerParams(
            dimension_semantics=("parallel", "arbitrary")),
    )


def _build_tap_masks(b, H, W, hid, K):
    """0/1 masks per conv tap over output lanes (lane = b*H*W + y*W + x)."""
    p = K // 2
    yy, xx = np.meshgrid(np.arange(H), np.arange(W), indexing="ij")
    out = np.zeros((K * K, hid, b * H * W), np.float32)
    for ky in range(K):
        for kx in range(K):
            dy, dx = ky - p, kx - p
            valid = ((yy + dy >= 0) & (yy + dy < H) &
                     (xx + dx >= 0) & (xx + dx < W)).astype(np.float32)   # (H, W)
            lane = np.tile(valid.reshape(-1), b)                           # (b*H*W,)
            out[ky * K + kx] = lane[None, :]
    return jnp.asarray(out)


def bcrnn_layer_forward(x_tbchw, hi_tbchw, params, K):
    """Pallas-backed BCRNNlayer.forward (matches the PyTorch module)."""
    t, b, cin, H, W = x_tbchw.shape
    hid = params["w_h2h"].shape[0]
    p = K // 2
    N = b * H * W

    # ---- static part in XLA: i2h(x) + ih2ih(hidden_iteration) + all three biases ----
    comb = jnp.concatenate([x_tbchw, hi_tbchw], axis=2).reshape(t * b, cin + hid, H, W)
    w_stat = jnp.concatenate([params["w_i2h"], params["w_ih2ih"]], axis=1)   # (hid, cin+hid, K, K)
    stat = lax.conv_general_dilated(
        comb.astype(jnp.float32), w_stat.astype(jnp.float32),
        window_strides=(1, 1), padding=((p, p), (p, p)),
        dimension_numbers=("NCHW", "OIHW", "NCHW"))                           # (t*b, hid, H, W)
    bias = (params["b_i2h"] + params["b_h2h"] + params["b_ih2ih"]).astype(jnp.float32)
    stat = stat + bias[None, :, None, None]
    # -> (t, hid, b*H*W), lane = b*H*W + y*W + x  (same lane layout as the carried state)
    stat = stat.reshape(t, b, hid, H * W).transpose(0, 2, 1, 3).reshape(t, hid, N)
    stat = stat.astype(jnp.bfloat16)

    # per-tap h2h weights: (K*K, cout, cin), f32
    wh = jnp.transpose(params["w_h2h"], (2, 3, 0, 1)).reshape(K * K, hid, hid).astype(jnp.float32)

    masks = _build_tap_masks(b, H, W, hid, K)                                 # (K*K, hid, N) f32

    out = _make_bcrnn_call(t, b, H, W, K, hid)(stat, wh, masks)               # (2, t, hid, N) f32

    # fused epilogue: out_f + out_b, reorder (hid, b) -> (b, hid), match PyTorch layout
    o = out[0] + out[1]                                                       # (t, hid, N)
    o = o.reshape(t, hid, b, H, W).transpose(0, 2, 1, 3, 4).reshape(t * b, hid, H, W)
    if b == 1:
        o = o.reshape(t, 1, hid, H, W)
    return o


# ----------------------- pure-JAX reference (for checking) -----------------------

def _conv2d_ref(x_nhwc, w_oikk, bias, p):
    w_hwio = jnp.transpose(w_oikk, (2, 3, 1, 0))
    y = lax.conv_general_dilated(x_nhwc, w_hwio, (1, 1), ((p, p), (p, p)),
                                 dimension_numbers=("NHWC", "HWIO", "NHWC"))
    return y + bias


def bcrnn_layer_reference(x_tbchw, hi_tbchw, params, K):
    t, b, cin, H, W = x_tbchw.shape
    hid = params["w_h2h"].shape[0]
    p = K // 2
    x = jnp.transpose(x_tbchw, (0, 1, 3, 4, 2)).astype(jnp.float32)
    hi = jnp.transpose(hi_tbchw, (0, 1, 3, 4, 2)).astype(jnp.float32)

    def cell(x_i, hi_i, h):
        y = (_conv2d_ref(x_i, params["w_i2h"], params["b_i2h"], p)
             + _conv2d_ref(h, params["w_h2h"], params["b_h2h"], p)
             + _conv2d_ref(hi_i, params["w_ih2ih"], params["b_ih2ih"], p))
        return jnp.maximum(y, 0.0)

    def step(h, xs):
        x_i, hi_i = xs
        new_h = cell(x_i, hi_i, h)
        return new_h, new_h

    h0 = jnp.zeros((b, H, W, hid), jnp.float32)
    _, out_f = lax.scan(step, h0, (x, hi))
    _, out_b_rev = lax.scan(step, h0, (x[::-1], hi[::-1]))
    out = out_f + out_b_rev[::-1]
    out = jnp.transpose(out, (0, 1, 4, 2, 3)).reshape(t * b, hid, H, W)
    if b == 1:
        out = out.reshape(t, 1, hid, H, W)
    return out


if __name__ == "__main__":
    T, B, CIN, HID, H, W, K = 8, 2, 4, 32, 16, 16, 3

    key = jax.random.PRNGKey(0)
    ks = jax.random.split(key, 8)
    x = jax.random.normal(ks[0], (T, B, CIN, H, W), jnp.float32)
    hi = jax.random.normal(ks[1], (T, B, HID, H, W), jnp.float32)

    def init_conv(kw, kb, cout, cin):
        scale = 1.0 / np.sqrt(cin * K * K)
        w = scale * jax.random.normal(kw, (cout, cin, K, K), jnp.float32)
        bsc = scale * jax.random.normal(kb, (cout,), jnp.float32)
        return w, bsc

    w_i2h, b_i2h = init_conv(ks[2], ks[3], HID, CIN)
    w_h2h, b_h2h = init_conv(ks[4], ks[5], HID, HID)
    w_ih2ih, b_ih2ih = init_conv(ks[6], ks[7], HID, HID)
    params = dict(w_i2h=w_i2h, b_i2h=b_i2h,
                  w_h2h=w_h2h, b_h2h=b_h2h,
                  w_ih2ih=w_ih2ih, b_ih2ih=b_ih2ih)

    fwd = jax.jit(functools.partial(bcrnn_layer_forward, K=K))
    out = jax.block_until_ready(fwd(x, hi, params))
    assert out.shape == (T * B, HID, H, W), out.shape

    ref = jax.block_until_ready(
        jax.jit(functools.partial(bcrnn_layer_reference, K=K))(x, hi, params))
    err = float(jnp.max(jnp.abs(out - ref)) / (jnp.max(jnp.abs(ref)) + 1e-6))
    assert err < 5e-2, f"mismatch vs reference: rel-to-max err = {err}"

    print("KERNEL_OK")
</pallas_src>

<mosaic_0001>
module attributes {stable_mosaic.version = 11 : i64} {
  func.func @_bcrnn_step_kernel(%arg0: i32, %arg1: i32, %arg2: memref<1x32x512xbf16, #tpu.memory_space<vmem>>, %arg3: memref<9x32x32xf32, #tpu.memory_space<vmem>>, %arg4: memref<9x32x512xf32, #tpu.memory_space<vmem>>, %arg5: memref<1x1x32x512xf32, #tpu.memory_space<vmem>>, %arg6: memref<2x32x768xf32, #tpu.memory_space<vmem>>) attributes {dimension_semantics = [#tpu.dimension_semantics<parallel>, #tpu.dimension_semantics<arbitrary>], iteration_bounds = array<i64: 2, 8>, scalar_prefetch = 0 : i64, scratch_operands = 1 : i64, tpu.core_type = #tpu.core_type<tc>, window_params = [{transform_indices = @transform_0, window_bounds = array<i64: 1, 32, 512>}, {pipeline_mode = #tpu.pipeline_mode<synchronous>, transform_indices = @transform_1, window_bounds = array<i64: 9, 32, 32>}, {pipeline_mode = #tpu.pipeline_mode<synchronous>, transform_indices = @transform_2, window_bounds = array<i64: 9, 32, 512>}, {transform_indices = @transform_3, window_bounds = array<i64: 1, 1, 32, 512>}]} {
    %c0_i32 = arith.constant 0 : i32
    %0 = arith.cmpi eq, %arg1, %c0_i32 : i32
    %1 = arith.extui %0 : i1 to i32
    %c0_i32_0 = arith.constant 0 : i32
    %2 = arith.cmpi ne, %1, %c0_i32_0 : i32
    scf.if %2 {
      %cst_62 = arith.constant 0.000000e+00 : f32
      %87 = vector.broadcast %cst_62 : f32 to vector<32x768xf32>
      %88 = arith.index_cast %arg0 : i32 to index
      %c0_63 = arith.constant 0 : index
      %c0_64 = arith.constant 0 : index
      %89 = vector.load %arg6[%88, %c0_63, %c0_64] : memref<2x32x768xf32, #tpu.memory_space<vmem>>, vector<1x32x768xf32>
      %90 = vector.shape_cast %89 : vector<1x32x768xf32> to vector<32x768xf32>
      %91 = vector.shape_cast %87 : vector<32x768xf32> to vector<1x32x768xf32>
      tpu.vector_store %arg6[%88, %c0_63, %c0_64], %91 {strides = array<i32>} : memref<2x32x768xf32, #tpu.memory_space<vmem>>, vector<1x32x768xf32>,
    } else {
    }
    %3 = arith.index_cast %arg0 : i32 to index
    %c0 = arith.constant 0 : index
    %c0_1 = arith.constant 0 : index
    %4 = vector.load %arg6[%3, %c0, %c0_1] : memref<2x32x768xf32, #tpu.memory_space<vmem>>, vector<1x32x768xf32>
    %5 = vector.shape_cast %4 : vector<1x32x768xf32> to vector<32x768xf32>
    %c0_2 = arith.constant 0 : index
    %c0_3 = arith.constant 0 : index
    %c0_4 = arith.constant 0 : index
    %6 = vector.load %arg2[%c0_2, %c0_3, %c0_4] : memref<1x32x512xbf16, #tpu.memory_space<vmem>>, vector<1x32x512xbf16>
    %7 = vector.shape_cast %6 : vector<1x32x512xbf16> to vector<32x512xbf16>
    %8 = arith.extf %7 : vector<32x512xbf16> to vector<32x512xf32>
    %9 = vector.extract_strided_slice %5 {offsets = [0, 111], sizes = [32, 512], strides = [1, 1]} : vector<32x768xf32> to vector<32x512xf32>
    %c0_5 = arith.constant 0 : index
    %c0_6 = arith.constant 0 : index
    %c0_7 = arith.constant 0 : index
    %10 = vector.load %arg4[%c0_5, %c0_6, %c0_7] : memref<9x32x512xf32, #tpu.memory_space<vmem>>, vector<1x32x512xf32>
    %11 = vector.shape_cast %10 : vector<1x32x512xf32> to vector<32x512xf32>
    %12 = arith.mulf %9, %11 : vector<32x512xf32>
    %c0_8 = arith.constant 0 : index
    %c0_9 = arith.constant 0 : index
    %c0_10 = arith.constant 0 : index
    %13 = vector.load %arg3[%c0_8, %c0_9, %c0_10] : memref<9x32x32xf32, #tpu.memory_space<vmem>>, vector<1x32x32xf32>
    %14 = vector.shape_cast %13 : vector<1x32x32xf32> to vector<32x32xf32>
    %cst = arith.constant dense<0.000000e+00> : vector<32x512xf32>
    %15 = tpu.matmul %14, %12, %cst {dimension_numbers = #tpu.dot_dimension_numbers<[1], [0], [0], [1], [0, 0, 1, 1], [], []>} : vector<32x32xf32>, vector<32x512xf32>, vector<32x512xf32> -> vector<32x512xf32>
    %16 = arith.addf %8, %15 : vector<32x512xf32>
    %17 = vector.extract_strided_slice %5 {offsets = [0, 112], sizes = [32, 512], strides = [1, 1]} : vector<32x768xf32> to vector<32x512xf32>
    %c1 = arith.constant 1 : index
    %c0_11 = arith.constant 0 : index
    %c0_12 = arith.constant 0 : index
    %18 = vector.load %arg4[%c1, %c0_11, %c0_12] : memref<9x32x512xf32, #tpu.memory_space<vmem>>, vector<1x32x512xf32>
    %19 = vector.shape_cast %18 : vector<1x32x512xf32> to vector<32x512xf32>
    %20 = arith.mulf %17, %19 : vector<32x512xf32>
    %c1_13 = arith.constant 1 : index
    %c0_14 = arith.constant 0 : index
    %c0_15 = arith.constant 0 : index
    %21 = vector.load %arg3[%c1_13, %c0_14, %c0_15] : memref<9x32x32xf32, #tpu.memory_space<vmem>>, vector<1x32x32xf32>
    %22 = vector.shape_cast %21 : vector<1x32x32xf32> to vector<32x32xf32>
    %cst_16 = arith.constant dense<0.000000e+00> : vector<32x512xf32>
    %23 = tpu.matmul %22, %20, %cst_16 {dimension_numbers = #tpu.dot_dimension_numbers<[1], [0], [0], [1], [0, 0, 1, 1], [], []>} : vector<32x32xf32>, vector<32x512xf32>, vector<32x512xf32> -> vector<32x512xf32>
    %24 = arith.addf %16, %23 : vector<32x512xf32>
    %25 = vector.extract_strided_slice %5 {offsets = [0, 113], sizes = [32, 512], strides = [1, 1]} : vector<32x768xf32> to vector<32x512xf32>
    %c2 = arith.constant 2 : index
    %c0_17 = arith.constant 0 : index
    %c0_18 = arith.constant 0 : index
    %26 = vector.load %arg4[%c2, %c0_17, %c0_18] : memref<9x32x512xf32, #tpu.memory_space<vmem>>, vector<1x32x512xf32>
    %27 = vector.shape_cast %26 : vector<1x32x512xf32> to vector<32x512xf32>
    %28 = arith.mulf %25, %27 : vector<32x512xf32>
    %c2_19 = arith.constant 2 : index
    %c0_20 = arith.constant 0 : index
    %c0_21 = arith.constant 0 : index
    %29 = vector.load %arg3[%c2_19, %c0_20, %c0_21] : memref<9x32x32xf32, #tpu.memory_space<vmem>>, vector<1x32x32xf32>
    %30 = vector.shape_cast %29 : vector<1x32x32xf32> to vector<32x32xf32>
    %cst_22 = arith.constant dense<0.000000e+00> : vector<32x512xf32>
    %31 = tpu.matmul %30, %28, %cst_22 {dimension_numbers = #tpu.dot_dimension_numbers<[1], [0], [0], [1], [0, 0, 1, 1], [], []>} : vector<32x32xf32>, vector<32x512xf32>, vector<32x512xf32> -> vector<32x512xf32>
    %32 = arith.addf %24, %31 : vector<32x512xf32>
    %33 = vector.extract_strided_slice %5 {offsets = [0, 127], sizes = [32, 512], strides = [1, 1]} : vector<32x768xf32> to vector<32x512xf32>
    %c3 = arith.constant 3 : index
    %c0_23 = arith.constant 0 : index
    %c0_24 = arith.constant 0 : index
    %34 = vector.load %arg4[%c3, %c0_23, %c0_24] : memref<9x32x512xf32, #tpu.memory_space<vmem>>, vector<1x32x512xf32>
    %35 = vector.shape_cast %34 : vector<1x32x512xf32> to vector<32x512xf32>
    %36 = arith.mulf %33, %35 : vector<32x512xf32>
    %c3_25 = arith.constant 3 : index
    %c0_26 = arith.constant 0 : index
    %c0_27 = arith.constant 0 : index
    %37 = vector.load %arg3[%c3_25, %c0_26, %c0_27] : memref<9x32x32xf32, #tpu.memory_space<vmem>>, vector<1x32x32xf32>
    %38 = vector.shape_cast %37 : vector<1x32x32xf32> to vector<32x32xf32>
    %cst_28 = arith.constant dense<0.000000e+00> : vector<32x512xf32>
    %39 = tpu.matmul %38, %36, %cst_28 {dimension_numbers = #tpu.dot_dimension_numbers<[1], [0], [0], [1], [0, 0, 1, 1], [], []>} : vector<32x32xf32>, vector<32x512xf32>, vector<32x512xf32> -> vector<32x512xf32>
    %40 = arith.addf %32, %39 : vector<32x512xf32>
    %41 = vector.extract_strided_slice %5 {offsets = [0, 128], sizes = [32, 512], strides = [1, 1]} : vector<32x768xf32> to vector<32x512xf32>
    %c4 = arith.constant 4 : index
    %c0_29 = arith.constant 0 : index
    %c0_30 = arith.constant 0 : index
    %42 = vector.load %arg3[%c4, %c0_29, %c0_30] : memref<9x32x32xf32, #tpu.memory_space<vmem>>, vector<1x32x32xf32>
    %43 = vector.shape_cast %42 : vector<1x32x32xf32> to vector<32x32xf32>
    %cst_31 = arith.constant dense<0.000000e+00> : vector<32x512xf32>
    %44 = tpu.matmul %43, %41, %cst_31 {dimension_numbers = #tpu.dot_dimension_numbers<[1], [0], [0], [1], [0, 0, 1, 1], [], []>} : vector<32x32xf32>, vector<32x512xf32>, vector<32x512xf32> -> vector<32x512xf32>
    %45 = arith.addf %40, %44 : vector<32x512xf32>
    %46 = vector.extract_strided_slice %5 {offsets = [0, 129], sizes = [32, 512], strides = [1, 1]} : vector<32x768xf32> to vector<32x512xf32>
    %c5 = arith.constant 5 : index
    %c0_32 = arith.constant 0 : index
    %c0_33 = arith.constant 0 : index
    %47 = vector.load %arg4[%c5, %c0_32, %c0_33] : memref<9x32x512xf32, #tpu.memory_space<vmem>>, vector<1x32x512xf32>
    %48 = vector.shape_cast %47 : vector<1x32x512xf32> to vector<32x512xf32>
    %49 = arith.mulf %46, %48 : vector<32x512xf32>
    %c5_34 = arith.constant 5 : index
    %c0_35 = arith.constant 0 : index
    %c0_36 = arith.constant 0 : index
    %50 = vector.load %arg3[%c5_34, %c0_35, %c0_36] : memref<9x32x32xf32, #tpu.memory_space<vmem>>, vector<1x32x32xf32>
    %51 = vector.shape_cast %50 : vector<1x32x32xf32> to vector<32x32xf32>
    %cst_37 = arith.constant dense<0.000000e+00> : vector<32x512xf32>
    %52 = tpu.matmul %51, %49, %cst_37 {dimension_numbers = #tpu.dot_dimension_numbers<[1], [0], [0], [1], [0, 0, 1, 1], [], []>} : vector<32x32xf32>, vector<32x512xf32>, vector<32x512xf32> -> vector<32x512xf32>
    %53 = arith.addf %45, %52 : vector<32x512xf32>
    %54 = vector.extract_strided_slice %5 {offsets = [0, 143], sizes = [32, 512], strides = [1, 1]} : vector<32x768xf32> to vector<32x512xf32>
    %c6 = arith.constant 6 : index
    %c0_38 = arith.constant 0 : index
    %c0_39 = arith.constant 0 : index
    %55 = vector.load %arg4[%c6, %c0_38, %c0_39] : memref<9x32x512xf32, #tpu.memory_space<vmem>>, vector<1x32x512xf32>
    %56 = vector.shape_cast %55 : vector<1x32x512xf32> to vector<32x512xf32>
    %57 = arith.mulf %54, %56 : vector<32x512xf32>
    %c6_40 = arith.constant 6 : index
    %c0_41 = arith.constant 0 : index
    %c0_42 = arith.constant 0 : index
    %58 = vector.load %arg3[%c6_40, %c0_41, %c0_42] : memref<9x32x32xf32, #tpu.memory_space<vmem>>, vector<1x32x32xf32>
    %59 = vector.shape_cast %58 : vector<1x32x32xf32> to vector<32x32xf32>
    %cst_43 = arith.constant dense<0.000000e+00> : vector<32x512xf32>
    %60 = tpu.matmul %59, %57, %cst_43 {dimension_numbers = #tpu.dot_dimension_numbers<[1], [0], [0], [1], [0, 0, 1, 1], [], []>} : vector<32x32xf32>, vector<32x512xf32>, vector<32x512xf32> -> vector<32x512xf32>
    %61 = arith.addf %53, %60 : vector<32x512xf32>
    %62 = vector.extract_strided_slice %5 {offsets = [0, 144], sizes = [32, 512], strides = [1, 1]} : vector<32x768xf32> to vector<32x512xf32>
    %c7 = arith.constant 7 : index
    %c0_44 = arith.constant 0 : index
    %c0_45 = arith.constant 0 : index
    %63 = vector.load %arg4[%c7, %c0_44, %c0_45] : memref<9x32x512xf32, #tpu.memory_space<vmem>>, vector<1x32x512xf32>
    %64 = vector.shape_cast %63 : vector<1x32x512xf32> to vector<32x512xf32>
    %65 = arith.mulf %62, %64 : vector<32x512xf32>
    %c7_46 = arith.constant 7 : index
    %c0_47 = arith.constant 0 : index
    %c0_48 = arith.constant 0 : index
    %66 = vector.load %arg3[%c7_46, %c0_47, %c0_48] : memref<9x32x32xf32, #tpu.memory_space<vmem>>, vector<1x32x32xf32>
    %67 = vector.shape_cast %66 : vector<1x32x32xf32> to vector<32x32xf32>
    %cst_49 = arith.constant dense<0.000000e+00> : vector<32x512xf32>
    %68 = tpu.matmul %67, %65, %cst_49 {dimension_numbers = #tpu.dot_dimension_numbers<[1], [0], [0], [1], [0, 0, 1, 1], [], []>} : vector<32x32xf32>, vector<32x512xf32>, vector<32x512xf32> -> vector<32x512xf32>
    %69 = arith.addf %61, %68 : vector<32x512xf32>
    %70 = vector.extract_strided_slice %5 {offsets = [0, 145], sizes = [32, 512], strides = [1, 1]} : vector<32x768xf32> to vector<32x512xf32>
    %c8 = arith.constant 8 : index
    %c0_50 = arith.constant 0 : index
    %c0_51 = arith.constant 0 : index
    %71 = vector.load %arg4[%c8, %c0_50, %c0_51] : memref<9x32x512xf32, #tpu.memory_space<vmem>>, vector<1x32x512xf32>
    %72 = vector.shape_cast %71 : vector<1x32x512xf32> to vector<32x512xf32>
    %73 = arith.mulf %70, %72 : vector<32x512xf32>
    %c8_52 = arith.constant 8 : index
    %c0_53 = arith.constant 0 : index
    %c0_54 = arith.constant 0 : index
    %74 = vector.load %arg3[%c8_52, %c0_53, %c0_54] : memref<9x32x32xf32, #tpu.memory_space<vmem>>, vector<1x32x32xf32>
    %75 = vector.shape_cast %74 : vector<1x32x32xf32> to vector<32x32xf32>
    %cst_55 = arith.constant dense<0.000000e+00> : vector<32x512xf32>
    %76 = tpu.matmul %75, %73, %cst_55 {dimension_numbers = #tpu.dot_dimension_numbers<[1], [0], [0], [1], [0, 0, 1, 1], [], []>} : vector<32x32xf32>, vector<32x512xf32>, vector<32x512xf32> -> vector<32x512xf32>
    %77 = arith.addf %69, %76 : vector<32x512xf32>
    %cst_56 = arith.constant 0.000000e+00 : f32
    %78 = vector.broadcast %cst_56 : f32 to vector<32x512xf32>
    %79 = arith.maximumf %77, %78 : vector<32x512xf32>
    %80 = arith.index_cast %arg0 : i32 to index
    %c0_57 = arith.constant 0 : index
    %c128 = arith.constant 128 : index
    %81 = vector.load %arg6[%80, %c0_57, %c128] : memref<2x32x768xf32, #tpu.memory_space<vmem>>, vector<1x32x512xf32>
    %82 = vector.shape_cast %81 : vector<1x32x512xf32> to vector<32x512xf32>
    %83 = vector.shape_cast %79 : vector<32x512xf32> to vector<1x32x512xf32>
    tpu.vector_store %arg6[%80, %c0_57, %c128], %83 {strides = array<i32>} : memref<2x32x768xf32, #tpu.memory_space<vmem>>, vector<1x32x512xf32>,
    %c0_58 = arith.constant 0 : index
    %c0_59 = arith.constant 0 : index
    %c0_60 = arith.constant 0 : index
    %c0_61 = arith.constant 0 : index
    %84 = vector.load %arg5[%c0_58, %c0_59, %c0_60, %c0_61] : memref<1x1x32x512xf32, #tpu.memory_space<vmem>>, vector<1x1x32x512xf32>
    %85 = vector.shape_cast %84 : vector<1x1x32x512xf32> to vector<32x512xf32>
    %86 = vector.shape_cast %79 : vector<32x512xf32> to vector<1x1x32x512xf32>
    tpu.vector_store %arg5[%c0_58, %c0_59, %c0_60, %c0_61], %86 {strides = array<i32>} : memref<1x1x32x512xf32, #tpu.memory_space<vmem>>, vector<1x1x32x512xf32>,
    return
  }
  func.func @transform_0(%arg0: i32, %arg1: i32) -> (i32, i32, i32) {
    %c2_i32 = arith.constant 2 : i32
    %0 = arith.muli %c2_i32, %arg1 : i32
    %c7_i32 = arith.constant 7 : i32
    %1 = arith.subi %c7_i32, %0 : i32
    %2 = arith.muli %arg0, %1 : i32
    %3 = arith.addi %2, %arg1 : i32
    %c0_i32 = arith.constant 0 : i32
    %c0_i32_0 = arith.constant 0 : i32
    %c0_i32_1 = arith.constant 0 : i32
    return %3, %c0_i32, %c0_i32_0 : i32, i32, i32
  }
  func.func @transform_1(%arg0: i32, %arg1: i32) -> (i32, i32, i32) {
    %c0_i32 = arith.constant 0 : i32
    %c0_i32_0 = arith.constant 0 : i32
    %c0_i32_1 = arith.constant 0 : i32
    %c0_i32_2 = arith.constant 0 : i32
    return %c0_i32, %c0_i32_0, %c0_i32_1 : i32, i32, i32
  }
  func.func @transform_2(%arg0: i32, %arg1: i32) -> (i32, i32, i32) {
    %c0_i32 = arith.constant 0 : i32
    %c0_i32_0 = arith.constant 0 : i32
    %c0_i32_1 = arith.constant 0 : i32
    %c0_i32_2 = arith.constant 0 : i32
    return %c0_i32, %c0_i32_0, %c0_i32_1 : i32, i32, i32
  }
  func.func @transform_3(%arg0: i32, %arg1: i32) -> (i32, i32, i32, i32) {
    %c2_i32 = arith.constant 2 : i32
    %0 = arith.muli %c2_i32, %arg1 : i32
    %c7_i32 = arith.constant 7 : i32
    %1 = arith.subi %c7_i32, %0 : i32
    %2 = arith.muli %arg0, %1 : i32
    %3 = arith.addi %2, %arg1 : i32
    %c0_i32 = arith.constant 0 : i32
    %c0_i32_0 = arith.constant 0 : i32
    %c0_i32_1 = arith.constant 0 : i32
    return %arg0, %3, %c0_i32, %c0_i32_0 : i32, i32, i32, i32
  }
}

</mosaic_0001>

<bundles_post_ra>
// kernel: bcrnn_layer_forward.1
= control target key start
LH: loop header
LB: loop body
LE: loop exit
PB: predicated region body
PF: predicated region fallthrough
CT: control target
= control target key end

     0   :  { %s5119_s12 = smov 0   ;;  %s5121_s13 = smov 0   ;;  %s6859_s0 = inlined_call_operand.vmem [shape: bf16[8,32,512], index: 0, kind: input, shape index: {}]   ;;  %s6860_s1 = inlined_call_operand.vmem [shape: f32[9,32,32], index: 1, kind: input, shape index: {}]   ;;  %s6861_s2 = inlined_call_operand.vmem [shape: f32[9,32,512], index: 2, kind: input, shape index: {}]   ;;  %s6862_s3 = inlined_call_operand.vmem [shape: f32[2,8,32,512], index: 3, kind: output, shape index: {}]  }
   0x1   :  { %s5123_s14 = smov 0   ;;  %s5125_s15 = smov 0  }
   0x2   :  { %s5127_s16 = smov 0  }
   0x3 LB: > { %s22_s17 = sadd.s32 1, %s5079_s14  ;;  %s25_s18 = sadd.s32 1, %s5083_s15  ;;  %s5087_s16 = sphi %s5127_s16, %s13_s16   ;;  %s5083_s15 = sphi %s5125_s15, %s6866_s15   ;;  %s5079_s14 = sphi %s5123_s14, %s6865_s14   ;;  %s5075_s13 = sphi %s5121_s13, %s6864_s13   ;;  %s5071_s12 = sphi %s5119_s12, %s6863_s12  }
   0x4   : > { %p23_p0 = scmp.ge.s32.totalorder %s22_s17, 8  ;;  %p4060_p1 = scmp.ge.s32.totalorder %s5087_s16, 1 }
   0x5   : > { %p175_p2 = scmp.lt.s32.totalorder %s5087_s16, 17 }
   0x6   : > { %s6868_s17 = smov (%p23_p0, %s22_s17), 0  ;;  %s6870_s18 = smov (!%p23_p0, %s25_s18), %s5083_s15 }
   0x7   : > { %p176_p3 = pnand %p4060_p1, %p175_p2  ;;  %p27_p4 = scmp.ge.s32.totalorder %s6870_s18, 2 }
   0x8   : > { %s4061_s19 = sshll.u32 (!%p176_p3), %s5071_s12, 1  ;;  %p228_p5 = scmp.lt.s32.totalorder (!%p176_p3), %s5075_s13, 1 }
   0x9   : > { %s6872_s18 = smov (%p27_p4, %s6870_s18), 0  ;;  %179 = sbr.rel (%p176_p3) target bundleno = 924 (0x39c), region = 32 }
   0xa   : > { %s212_s20 = ssub.s32 (!%p176_p3), 7, %s4061_s19  ;;  %p4068_p7 = scmp.ne.s32.totalorder (!%p176_p3), %s5071_s12, 0 }
   0xb   : > { %s213_s21 = smul.u32 (!%p176_p3), %s5075_s13, %s212_s20 }
   0xd   : > { %s214_s23 = sadd.s32 (!%p176_p3), %s5071_s12, %s213_s21 }
   0xe   : > { %p215_p6 = scmp.lt.s32.totalorder (!%p176_p3), %s214_s23, 7 }
  0x10   : > { %s229_s22 = scalar_select %p228_p5, %s5075_s13, 1 }
  0x11   : > { %s6874_s23 = smov (!%p215_p6, %s214_s23), 7  ;;  %244 = sbr.rel (%p4068_p7) target bundleno = 35 (0x23), region = 36 }
  0x12   : > { %s4066_s24 = sshll.u32 %s229_s22, 7  ;;  %s4289_s25 = sshll.u32 %s6874_s23, 6  ;;  %v5089_v0 = vmov (!%p4068_p7), 0.0  }
  0x13   : > { %s4065_s26 = sshll.u32 %s6874_s23, 4  ;;  %s5161_s29 = scalar_lea.vmem %s6859_s0, %s4289_s25 }
  0x14   : > { %s234_s30 = sadd.s32 %s4066_s24, %s4065_s26  ;;  %s4290_s8 = smul.u32 (!%p4068_p7), 192, %s5075_s13 }
  0x15   : > { %s4067_s4 = sshll.u32 %s234_s30, 3 }
  0x16   : > { %s5166_s7 = scalar_lea.vmem %s6862_s3, %s4067_s4  ;;  %s247_s9 = scalar_lea.vmem (!%p4068_p7), [#allocation2], %s4290_s8 }
  0x17   : > { %248 = vst [vmem:[%s247_s9] sm:$0xff] (!%p4068_p7), %v5089_v0  ;;  %249 = vst [vmem:[%s247_s9 + $0x8] sm:$0xff] (!%p4068_p7), %v5089_v0 }
  0x18   : > { %250 = vst [vmem:[%s247_s9 + $0x10] sm:$0xff] %v5089_v0  ;;  %251 = vst [vmem:[%s247_s9 + $0x18] sm:$0xff] %v5089_v0 }
  0x19   : > { %252 = vst [vmem:[%s247_s9 + $0x20] sm:$0xff] %v5089_v0  ;;  %253 = vst [vmem:[%s247_s9 + $0x28] sm:$0xff] %v5089_v0 }
  0x1a   : > { %254 = vst [vmem:[%s247_s9 + $0x30] sm:$0xff] %v5089_v0  ;;  %255 = vst [vmem:[%s247_s9 + $0x38] sm:$0xff] %v5089_v0 }
  0x1b   : > { %256 = vst [vmem:[%s247_s9 + $0x40] sm:$0xff] %v5089_v0  ;;  %257 = vst [vmem:[%s247_s9 + $0x48] sm:$0xff] %v5089_v0 }
  0x1c   : > { %258 = vst [vmem:[%s247_s9 + $0x50] sm:$0xff] %v5089_v0  ;;  %259 = vst [vmem:[%s247_s9 + $0x58] sm:$0xff] %v5089_v0 }
  0x1d   : > { %260 = vst [vmem:[%s247_s9 + $0x60] sm:$0xff] %v5089_v0  ;;  %261 = vst [vmem:[%s247_s9 + $0x68] sm:$0xff] %v5089_v0 }
  0x1e   : > { %262 = vst [vmem:[%s247_s9 + $0x70] sm:$0xff] %v5089_v0  ;;  %263 = vst [vmem:[%s247_s9 + $0x78] sm:$0xff] %v5089_v0 }
  0x1f   : > { %264 = vst [vmem:[%s247_s9 + $0x80] sm:$0xff] %v5089_v0  ;;  %265 = vst [vmem:[%s247_s9 + $0x88] sm:$0xff] %v5089_v0 }
  0x20   : > { %266 = vst [vmem:[%s247_s9 + $0x90] sm:$0xff] %v5089_v0  ;;  %267 = vst [vmem:[%s247_s9 + $0x98] sm:$0xff] %v5089_v0 }
  0x21   : > { %268 = vst [vmem:[%s247_s9 + $0xa0] sm:$0xff] %v5089_v0  ;;  %269 = vst [vmem:[%s247_s9 + $0xa8] sm:$0xff] %v5089_v0 }
  0x22   : > { %270 = vst [vmem:[%s247_s9 + $0xb0] sm:$0xff] %v5089_v0  ;;  %271 = vst [vmem:[%s247_s9 + $0xb8] sm:$0xff] %v5089_v0 }
  0x23 PF: > { %v325_v1 = vld [vmem:[%s6861_s2 + $0x10] sm:$0xff]  ;;  %v323_v2 = vld [vmem:[%s6861_s2] sm:$0xff]  ;;  %s5090_s20 = smov 111   ;;  %v326_v3 = vld [vmem:[%s6861_s2 + $0x18] sm:$0xff]  ;;  %s5091_s10 = smov 112   ;;  %vm387_vm0 = vcmask 908288  }
  0x24   : > { %359 = vrot.lane.b32.xlu1 %v325_v1, %s5090_s20  ;;  %355 = vrot.lane.b32.xlu0 %v323_v2, %s5090_s20  ;;  %v324_v4 = vld [vmem:[%s6861_s2 + $0x8] sm:$0xff]  ;;  %v327_v6 = vld [vmem:[%s6861_s2 + $0x20] sm:$0xff]  ;;  %s5092_s8 = smov 113   ;;  %s4291_s23 = smul.u32 192, %s5075_s13  ;;  %vm809_vm1 = vcmask 916480   ;;  %vm1231_vm2 = vcmask 924672  }
  0x25   : > { %v328_v5 = vld [vmem:[%s6861_s2 + $0x28] sm:$0xff]  ;;  %v330_v7 = vld [vmem:[%s6861_s2 + $0x38] sm:$0xff]  ;;  %v329_v8 = vld [vmem:[%s6861_s2 + $0x30] sm:$0xff]  ;;  %s5093_s13 = smov 17   ;;  %s5094_s25 = smov 16   ;;  %vm504_vm3 = vcmask 138240  }
  0x26   : > { %v332_v9 = vld [vmem:[%s6861_s2 + $0x48] sm:$0xff]  ;;  %v331_v10 = vld [vmem:[%s6861_s2 + $0x40] sm:$0xff]  ;;  %v334_v11 = vld [vmem:[%s6861_s2 + $0x58] sm:$0xff]  ;;  %s5353_s24 = scalar_lea.vmem [#allocation2], %s4291_s23  ;;  %s5096_s4 = smov 127   ;;  %vm927_vm4 = vcmask 130048  }
  0x27   : > { %v333_v12 = vld [vmem:[%s6861_s2 + $0x50] sm:$0xff]  ;;  %v336_v13 = vld [vmem:[%s6861_s2 + $0x68] sm:$0xff]  ;;  %v335_v14 = vld [vmem:[%s6861_s2 + $0x60] sm:$0xff]  ;;  %s5097_s9 = smov 1   ;;  %s5098_s28 = smov 15   ;;  %vm537_vm5 = vcmask 261120  }
  0x28   : > { %361 = vrot.lane.b32.xlu1 %v326_v3, %s5090_s20  ;;  %357 = vrot.lane.b32.xlu0 %v324_v4, %s5090_s20  ;;  %v338_v15 = vld [vmem:[%s6861_s2 + $0x78] sm:$0xff]  ;;  %v337_v16 = vld [vmem:[%s6861_s2 + $0x70] sm:$0xff]  ;;  %vm1653_vm6 = vcmask 1039360   ;;  %vm1349_vm7 = vcmask 121856   ;;  %vm1771_vm8 = vcmask 7168  }
  0x29   : > { %v4080_v17 = vld [vmem:[%s6861_s2 + $0x88] sm:$0xff]  ;;  %v4079_v18 = vld [vmem:[%s6861_s2 + $0x80] sm:$0xff]  ;;  %v4082_v19 = vld [vmem:[%s6861_s2 + $0x98] sm:$0xff] }
  0x2a   : > { %v4081_v20 = vld [vmem:[%s6861_s2 + $0x90] sm:$0xff]  ;;  %v4084_v21 = vld [vmem:[%s6861_s2 + $0xa8] sm:$0xff]  ;;  %v4083_v22 = vld [vmem:[%s6861_s2 + $0xa0] sm:$0xff] }
  0x2b   : > { %v4085_v23 = vld [vmem:[%s6861_s2 + $0xb0] sm:$0xff]  ;;  %v4086_v24 = vld [vmem:[%s6861_s2 + $0xb8] sm:$0xff]  ;;  %v4087_v25 = vld [vmem:[%s6861_s2 + $0xc0] sm:$0xff] }
  0x2c   : > { %365 = vrot.lane.b32.xlu1 %v328_v5, %s5090_s20  ;;  %363 = vrot.lane.b32.xlu0 %v327_v6, %s5090_s20  ;;  %v4088_v26 = vld [vmem:[%s6861_s2 + $0xc8] sm:$0xff]  ;;  %v4089_v27 = vld [vmem:[%s6861_s2 + $0xd0] sm:$0xff] }
  0x2d   : > { %v4090_v28 = vld [vmem:[%s6861_s2 + $0xd8] sm:$0xff]  ;;  %v4091_v29 = vld [vmem:[%s6861_s2 + $0xe0] sm:$0xff]  ;;  %v4092_v30 = vld [vmem:[%s6861_s2 + $0xe8] sm:$0xff] }
  0x2e   : > { %v4093_v31 = vld [vmem:[%s6861_s2 + $0xf0] sm:$0xff]  ;;  %v4094_v32 = vld [vmem:[%s6861_s2 + $0xf8] sm:$0xff]  ;;  %v4108_v33 = vld [vmem:[%s6861_s2 + $0x108] sm:$0xff] }
  0x2f   : > { %v4107_v34 = vld [vmem:[%s6861_s2 + $0x100] sm:$0xff]  ;;  %v4110_v35 = vld [vmem:[%s6861_s2 + $0x118] sm:$0xff]  ;;  %v4109_v36 = vld [vmem:[%s6861_s2 + $0x110] sm:$0xff] }
  0x30   : > { %369 = vrot.lane.b32.xlu1 %v330_v7, %s5090_s20  ;;  %367 = vrot.lane.b32.xlu0 %v329_v8, %s5090_s20  ;;  %v4112_v37 = vld [vmem:[%s6861_s2 + $0x128] sm:$0xff]  ;;  %v4111_v38 = vld [vmem:[%s6861_s2 + $0x120] sm:$0xff] }
  0x31   : > { %v4114_v39 = vld [vmem:[%s6861_s2 + $0x138] sm:$0xff]  ;;  %v4113_v40 = vld [vmem:[%s6861_s2 + $0x130] sm:$0xff]  ;;  %v4116_v41 = vld [vmem:[%s6861_s2 + $0x148] sm:$0xff] }
  0x32   : > { %v4115_v42 = vld [vmem:[%s6861_s2 + $0x140] sm:$0xff]  ;;  %v4118_v43 = vld [vmem:[%s6861_s2 + $0x158] sm:$0xff]  ;;  %v4117_v44 = vld [vmem:[%s6861_s2 + $0x150] sm:$0xff] }
  0x33   : > { %v4119_v45 = vld [vmem:[%s6861_s2 + $0x160] sm:$0xff]  ;;  %v5359_v51 = vld [vmem:[%s5353_s24 + $0x30] sm:$0xff]  ;;  %v5383_v2 = vld [vmem:[%s5353_s24 + $0x18] sm:$0xff] }
  0x34   : > { %373 = vrot.lane.b32.xlu1 %v332_v9, %s5090_s20  ;;  %371 = vrot.lane.b32.xlu0 %v331_v10, %s5090_s20  ;;  %v5356_v49 = vld [vmem:[%s5353_s24 + $0x20] sm:$0xff]  ;;  %v5378_v0 = vld [vmem:[%s5353_s24 + $0x90] sm:$0xff] }
  0x35   : > { %v5373_v62 = vld [vmem:[%s5353_s24 + $0x80] sm:$0xff]  ;;  %v5387_v4 = vld [vmem:[%s5353_s24 + $0x10] sm:$0xff] }
  0x38   : > { %377 = vrot.lane.b32.xlu1 %v334_v11, %s5090_s20  ;;  %375 = vrot.lane.b32.xlu0 %v333_v12, %s5090_s20  ;;  %v5399_v12 = vld [vmem:[%s5353_s24 + $0x40] sm:$0xff] }
  0x3c   : > { %381 = vrot.lane.b32.xlu1 %v336_v13, %s5090_s20  ;;  %379 = vrot.lane.b32.xlu0 %v335_v14, %s5090_s20 }
  0x40   : > { %385 = vrot.lane.b32.xlu1 %v338_v15, %s5090_s20  ;;  %383 = vrot.lane.b32.xlu0 %v337_v16, %s5090_s20  ;;  %v5407_v16 = vld [vmem:[%s5353_s24 + $0x38] sm:$0xff] }
  0x44   : > { %779 = vrot.lane.b32.xlu1 %v4080_v17, %s5091_s10  ;;  %777 = vrot.lane.b32.xlu0 %v4079_v18, %s5091_s10 }
  0x48   : > { %783 = vrot.lane.b32.xlu1 %v4082_v19, %s5091_s10  ;;  %781 = vrot.lane.b32.xlu0 %v4081_v20, %s5091_s10  ;;  %v5412_v20 = vld [vmem:[%s5353_s24 + $0x60] sm:$0xff] }
  0x4c   : > { %787 = vrot.lane.b32.xlu1 %v4084_v21, %s5091_s10  ;;  %785 = vrot.lane.b32.xlu0 %v4083_v22, %s5091_s10  ;;  %v5415_v21 = vld [vmem:[%s5353_s24 + $0x68] sm:$0xff] }
  0x50   : > { %789 = vrot.lane.b32.xlu0 %v4085_v23, %s5091_s10  ;;  %791 = vrot.lane.b32.xlu1 %v4086_v24, %s5091_s10 }
  0x54   : > { %793 = vrot.lane.b32.xlu0 %v4087_v25, %s5091_s10  ;;  %795 = vrot.lane.b32.xlu1 %v4088_v26, %s5091_s10 }
  0x58   : > { %797 = vrot.lane.b32.xlu0 %v4089_v27, %s5091_s10  ;;  %799 = vrot.lane.b32.xlu1 %v4090_v28, %s5091_s10 }
  0x5c   : > { %801 = vrot.lane.b32.xlu0 %v4091_v29, %s5091_s10  ;;  %803 = vrot.lane.b32.xlu1 %v4092_v30, %s5091_s10  ;;  %v5428_v29 = vld [vmem:[%s5353_s24 + $0xb0] sm:$0xff]  ;;  %v5431_v30 = vld [vmem:[%s5353_s24 + $0xa8] sm:$0xff] }
  0x60   : > { %805 = vrot.lane.b32.xlu0 %v4093_v31, %s5091_s10  ;;  %807 = vrot.lane.b32.xlu1 %v4094_v32, %s5091_s10 }
  0x64   : > { %1201 = vrot.lane.b32.xlu0 %v4108_v33, %s5092_s8  ;;  %1199 = vrot.lane.b32.xlu1 %v4107_v34, %s5092_s8 }
  0x68   : > { %1205 = vrot.lane.b32.xlu0 %v4110_v35, %s5092_s8  ;;  %1203 = vrot.lane.b32.xlu1 %v4109_v36, %s5092_s8  ;;  %v5439_v35 = vld [vmem:[%s5353_s24 + $0x8] sm:$0xff] }
  0x6c   : > { %1209 = vrot.lane.b32.xlu0 %v4112_v37, %s5092_s8  ;;  %1207 = vrot.lane.b32.xlu1 %v4111_v38, %s5092_s8 }
  0x70   : > { %1213 = vrot.lane.b32.xlu0 %v4114_v39, %s5092_s8  ;;  %1211 = vrot.lane.b32.xlu1 %v4113_v40, %s5092_s8 }
  0x74   : > { %1217 = vrot.lane.b32.xlu0 %v4116_v41, %s5092_s8  ;;  %1215 = vrot.lane.b32.xlu1 %v4115_v42, %s5092_s8 }
  0x78   : > { %1221 = vrot.lane.b32.xlu0 %v4118_v43, %s5092_s8  ;;  %1219 = vrot.lane.b32.xlu1 %v4117_v44, %s5092_s8  ;;  %v5448_v43 = vld [vmem:[%s5353_s24] sm:$0xff] }
  0x7c   : > { %1223 = vrot.lane.b32.xlu1 %v4119_v45, %s5092_s8 }
  0x96   : > { %v360_v46 = vpop.permute.xlu1 %359  ;;  %v5351_v47 = vpop.permute.xlu0 %355 }
  0x9a   : > { %v362_v48 = vpop.permute.xlu1 %361  ;;  %v358_v50 = vpop.permute.xlu0 %357 }
  0x9b   : > { %v424_v52 = vmul.f32 %v362_v48, %v5356_v49  ;;  %v390_v3 = vsel %vm387_vm0, %v360_v46, %v362_v48  ;;  %v389_v5 = vsel %vm387_vm0, %v358_v50, %v360_v46  ;;  %v388_v34 = vsel %vm387_vm0, %v5351_v47, %v358_v50 }
  0x9c   : > { %v423_v9 = vmul.f32 %v390_v3, %v5383_v2  ;;  %v422_v10 = vmul.f32 %v389_v5, %v5387_v4  ;;  %v421_v45 = vmul.f32 %v388_v34, %v5439_v35  ;;  %v5095_v34 = vmov 0.0  }
  0x9d   : > { %614 = vmatprep.mubr.f32.mxu0 %v5095_v34  ;;  %703 = vmatprep.mubr.f32.mxu1 %v5095_v34 }
  0x9e   : > { %v366_v53 = vpop.permute.xlu1 %365  ;;  %v364_v54 = vpop.permute.xlu0 %363  ;;  %v4650_v19 = vpack.i.bf16 %v423_v9, %v422_v10 }
  0x9f   : > { %v425_v55 = vmul.f32 %v364_v54, %v5359_v51  ;;  %v391_v17 = vsel %vm387_vm0, %v364_v54, %v366_v53  ;;  %v420_v54 = vmul.f32 %v5351_v47, %v5448_v43 }
  0xa0   : > { %v426_v25 = vmul.f32 %v391_v17, %v5407_v16 }
  0xa1   : > { %v4630_v56 = vpack.i.bf16 %v425_v55, %v424_v52  ;;  %v5458_v55 = vld [vmem:[%s5353_s24 + $0x50] sm:$0xff]  ;;  %v4645_v47 = vpack.i.bf16 %v421_v45, %v420_v54  ;;  %v4120_v45 = vld [vmem:[%s6861_s2 + $0x168] sm:$0xff]  ;;  %v4147_v54 = vld [vmem:[%s6861_s2 + $0x1e0] sm:$0xff] }
  0xa2   : > { %v5363_v57 = vpop.permute.xlu1 %369  ;;  %v5365_v58 = vpop.permute.xlu0 %367 }
  0xa3   : > { %4631 = vrot.lane.b32.xlu0 %v4630_v56, %s5093_s13  ;;  %v392_v13 = vsel %vm387_vm0, %v366_v53, %v5365_v58  ;;  %v5461_v56 = vld [vmem:[%s5353_s24 + $0x48] sm:$0xff] }
  0xa4   : > { %v427_v18 = vmul.f32 %v392_v13, %v5399_v12  ;;  %v5478_v13 = vld [vmem:[%s5353_s24 + $0x78] sm:$0xff] }
  0xa6   : > { %v5368_v59 = vpop.permute.xlu1 %373  ;;  %v372_v60 = vpop.permute.xlu0 %371  ;;  %v4655_v28 = vpack.i.bf16 %v427_v18, %v426_v25 }
  0xa7   : > { %v394_v22 = vsel %vm387_vm0, %v372_v60, %v5368_v59  ;;  %v430_v26 = vmul.f32 %v372_v60, %v5412_v20  ;;  %v393_v60 = vsel %vm387_vm0, %v5365_v58, %v5363_v57 }
  0xa8   : > { %v431_v27 = vmul.f32 %v394_v22, %v5415_v21  ;;  %v428_v9 = vmul.f32 %v393_v60, %v5461_v56  ;;  %v4138_v60 = vld [vmem:[%s6861_s2 + $0x198] sm:$0xff] }
  0xaa   : > { %v5370_v61 = vpop.permute.xlu1 %377  ;;  %v5375_v63 = vpop.permute.xlu0 %375  ;;  %v4665_v39 = vpack.i.bf16 %v431_v27, %v430_v26  ;;  %v5492_v26 = vld [vmem:[%s5353_s24 + $0xa0] sm:$0xff]  ;;  %v4121_v27 = vld [vmem:[%s6861_s2 + $0x170] sm:$0xff] }
  0xab   : > { %v434_v1 = vmul.f32 %v5370_v61, %v5373_v62  ;;  %v396_v17 = vsel %vm387_vm0, %v5375_v63, %v5370_v61  ;;  %v5500_v61 = vld [vmem:[%s5353_s24 + $0x98] sm:$0xff] }
  0xae   : > { %v5390_v6 = vpop.permute.xlu1 %381  ;;  %v5392_v7 = vpop.permute.xlu0 %379 }
  0xaf   : > { %v435_v8 = vmul.f32 %v5392_v7, %v5378_v0 }
  0xb1   : > { %v4635_v11 = vpack.i.bf16 %v435_v8, %v434_v1  ;;  %v429_v8 = vmul.f32 %v5363_v57, %v5458_v55 }
  0xb2   : > { %v386_v14 = vpop.permute.xlu1 %385  ;;  %v5403_v15 = vpop.permute.xlu0 %383 }
  0xb3   : > { %4636 = vrot.lane.b32.xlu1 %v4635_v11, %s5093_s13  ;;  %v399_v31 = vsel %vm387_vm0, %v5403_v15, %v386_v14  ;;  %v439_v36 = vmul.f32 %v386_v14, %v5428_v29  ;;  %v5475_v11 = vld [vmem:[%s5353_s24 + $0x70] sm:$0xff]  ;;  %v395_v14 = vsel %vm387_vm0, %v5368_v59, %v5375_v63  ;;  %v4660_v25 = vpack.i.bf16 %v429_v8, %v428_v9 }
  0xb4   : > { %v438_v37 = vmul.f32 %v399_v31, %v5431_v30  ;;  %v432_v18 = vmul.f32 %v395_v14, %v5475_v11  ;;  %v398_v59 = vsel %vm387_vm0, %v5390_v6, %v5403_v15  ;;  %v397_v63 = vsel %vm387_vm0, %v5392_v7, %v5390_v6  ;;  %v4135_v6 = vld [vmem:[%s6861_s2 + $0x180] sm:$0xff]  ;;  %v4177_v14 = vld [vmem:[%s6861_s2 + $0x290] sm:$0xff] }
  0xb6   : > { %v5419_v23 = vpop.permute.xlu1 %779  ;;  %v5421_v24 = vpop.permute.xlu0 %777  ;;  %v4680_v53 = vpack.i.bf16 %v439_v36, %v438_v37 }
  0xb7   : > { %4651 = vrot.lane.b32.xlu1 %v4650_v19, %s5093_s13  ;;  %v433_v19 = vmul.f32 %v396_v17, %v5478_v13  ;;  %v810_v15 = vsel %vm809_vm1, %v5421_v24, %v5419_v23  ;;  %v4144_v17 = vld [vmem:[%s6861_s2 + $0x1c8] sm:$0xff] }
  0xb8   : > { %v843_v36 = vmul.f32 %v810_v15, %v5439_v35  ;;  %v4148_v15 = vld [vmem:[%s6861_s2 + $0x1e8] sm:$0xff] }
  0xb9   : > { %v4670_v31 = vpack.i.bf16 %v433_v19, %v432_v18 }
  0xba   : > { %v782_v32 = vpop.permute.xlu0 %781  ;;  %v784_v33 = vpop.permute.xlu1 %783 }
  0xbb   : > { %4656 = vrot.lane.b32.xlu1 %v4655_v28, %s5093_s13  ;;  %v846_v38 = vmul.f32 %v784_v33, %v5356_v49  ;;  %v811_v40 = vsel %vm809_vm1, %v5419_v23, %v782_v32  ;;  %v812_v41 = vsel %vm809_vm1, %v782_v32, %v784_v33  ;;  %v437_v28 = vmul.f32 %v398_v59, %v5492_v26  ;;  %v4146_v59 = vld [vmem:[%s6861_s2 + $0x1d8] sm:$0xff] }
  0xbc   : > { %v844_v46 = vmul.f32 %v811_v40, %v5387_v4  ;;  %v845_v48 = vmul.f32 %v812_v41, %v5383_v2  ;;  %v436_v33 = vmul.f32 %v397_v63, %v5500_v61  ;;  %v842_v23 = vmul.f32 %v5421_v24, %v5448_v43  ;;  %v4137_v40 = vld [vmem:[%s6861_s2 + $0x190] sm:$0xff] }
  0xbe   : > { %v786_v42 = vpop.permute.xlu0 %785  ;;  %v788_v50 = vpop.permute.xlu1 %787  ;;  %v4690_v58 = vpack.i.bf16 %v845_v48, %v844_v46  ;;  %v4675_v37 = vpack.i.bf16 %v437_v28, %v436_v33  ;;  %v4685_v41 = vpack.i.bf16 %v843_v36, %v842_v23  ;;  %v4143_v46 = vld [vmem:[%s6861_s2 + $0x1c0] sm:$0xff]  ;;  %v4122_v48 = vld [vmem:[%s6861_s2 + $0x178] sm:$0xff] }
  0xbf   : > { %v847_v44 = vmul.f32 %v786_v42, %v5359_v51  ;;  %4666 = vrot.lane.b32.xlu1 %v4665_v39, %s5093_s13  ;;  %v813_v5 = vsel %vm809_vm1, %v786_v42, %v788_v50  ;;  %v4139_v42 = vld [vmem:[%s6861_s2 + $0x1a0] sm:$0xff] }
  0xc0   : > { %v848_v57 = vmul.f32 %v813_v5, %v5407_v16  ;;  %v4149_v5 = vld [vmem:[%s6861_s2 + $0x1f0] sm:$0xff] }
  0xc1   : > { %v4640_v52 = vpack.i.bf16 %v847_v44, %v846_v38  ;;  %v4141_v44 = vld [vmem:[%s6861_s2 + $0x1b0] sm:$0xff] }
  0xc2   : > { %v790_v1 = vpop.permute.xlu0 %789  ;;  %v792_v32 = vpop.permute.xlu1 %791 }
  0xc3   : > { %v814_v3 = vsel %vm809_vm1, %v788_v50, %v790_v1  ;;  %4641 = vrot.lane.b32.xlu0 %v4640_v52, %s5094_s25  ;;  %4681 = vrot.lane.b32.xlu1 %v4680_v53, %s5093_s13  ;;  %v815_v7 = vsel %vm809_vm1, %v790_v1, %v792_v32  ;;  %v851_v39 = vmul.f32 %v792_v32, %v5458_v55  ;;  %v4145_v52 = vld [vmem:[%s6861_s2 + $0x1d0] sm:$0xff]  ;;  %v4136_v53 = vld [vmem:[%s6861_s2 + $0x188] sm:$0xff] }
  0xc4   : > { %v849_v10 = vmul.f32 %v814_v3, %v5399_v12  ;;  %v850_v38 = vmul.f32 %v815_v7, %v5461_v56  ;;  %v4181_v32 = vld [vmem:[%s6861_s2 + $0x2b0] sm:$0xff] }
  0xc6   : > { %v4695_v22 = vpack.i.bf16 %v849_v10, %v848_v57  ;;  %v4700_v24 = vpack.i.bf16 %v851_v39, %v850_v38  ;;  %v796_v50 = vpop.permute.xlu1 %795  ;;  %v794_v1 = vpop.permute.xlu0 %793  ;;  %v4175_v10 = vld [vmem:[%s6861_s2 + $0x280] sm:$0xff] }
  0xc7   : > { %4691 = vrot.lane.b32.xlu1 %v4690_v58, %s5094_s25  ;;  %4646 = vrot.lane.b32.xlu0 %v4645_v47, %s5093_s13  ;;  %v4140_v47 = vld [vmem:[%s6861_s2 + $0x1a8] sm:$0xff]  ;;  %v4142_v58 = vld [vmem:[%s6861_s2 + $0x1b8] sm:$0xff]  ;;  %v816_v19 = vsel %vm809_vm1, %v794_v1, %v796_v50  ;;  %v852_v39 = vmul.f32 %v794_v1, %v5412_v20 }
  0xc8   : > { %v853_v63 = vmul.f32 %v816_v19, %v5415_v21  ;;  %v4186_v1 = vld [vmem:[%s6861_s2 + $0x2d8] sm:$0xff] }
  0xca   : > { %v5568_v3 = vpop.permute.xlu1 %799  ;;  %v798_v8 = vpop.permute.xlu0 %797 }
  0xcb   : > { %4696 = vrot.lane.b32.xlu1 %v4695_v22, %s5094_s25  ;;  %4661 = vrot.lane.b32.xlu0 %v4660_v25, %s5093_s13  ;;  %v817_v22 = vsel %vm809_vm1, %v796_v50, %v798_v8  ;;  %v4179_v25 = vld [vmem:[%s6861_s2 + $0x2a0] sm:$0xff]  ;;  %v4184_v50 = vld [vmem:[%s6861_s2 + $0x2c8] sm:$0xff] }
  0xce   : > { %v804_v9 = vpop.permute.xlu1 %803  ;;  %v802_v57 = vpop.permute.xlu0 %801 }
  0xcf   : > { %1227 = vrot.lane.b32.xlu1 %v4121_v27, %s5092_s8  ;;  %4671 = vrot.lane.b32.xlu0 %v4670_v31, %s5093_s13  ;;  %v854_v27 = vmul.f32 %v817_v22, %v5475_v11  ;;  %v819_v33 = vsel %vm809_vm1, %v802_v57, %v804_v9 }
  0xd0   : > { %v858_v7 = vmul.f32 %v819_v33, %v5500_v61  ;;  %v4183_v33 = vld [vmem:[%s6861_s2 + $0x2c0] sm:$0xff] }
  0xd1   : > { %v4705_v36 = vpack.i.bf16 %v854_v27, %v853_v63  ;;  %v4190_v63 = vld [vmem:[%s6861_s2 + $0x2f8] sm:$0xff] }
  0xd2   : > { %v808_v18 = vpop.permute.xlu1 %807  ;;  %v806_v28 = vpop.permute.xlu0 %805 }
  0xd3   : > { %1621 = vrot.lane.b32.xlu1 %v4135_v6, %s5096_s4  ;;  %4676 = vrot.lane.b32.xlu0 %v4675_v37, %s5093_s13  ;;  %v820_v6 = vsel %vm809_vm1, %v804_v9, %v806_v28  ;;  %v4150_v37 = vld [vmem:[%s6861_s2 + $0x1f8] sm:$0xff]  ;;  %v856_v9 = vmul.f32 %v5568_v3, %v5373_v62 }
  0xd4   : > { %v859_v23 = vmul.f32 %v820_v6, %v5492_v26 }
  0xd6   : > { %v5608_v31 = vpop.permute.xlu1 %1199 }
  0xd7   : > { %1625 = vrot.lane.b32.xlu1 %v4137_v40, %s5096_s4  ;;  %4686 = vrot.lane.b32.xlu0 %v4685_v41, %s5094_s25  ;;  %v857_v40 = vmul.f32 %v802_v57, %v5378_v0  ;;  %v4715_v41 = vpack.i.bf16 %v859_v23, %v858_v7  ;;  %v4188_v57 = vld [vmem:[%s6861_s2 + $0x2e8] sm:$0xff]  ;;  %v4185_v23 = vld [vmem:[%s6861_s2 + $0x2d0] sm:$0xff] }
  0xda   : > { %v5625_v38 = vpop.permute.xlu1 %1203 }
  0xdb   : > { %1629 = vrot.lane.b32.xlu1 %v4139_v42, %s5096_s4  ;;  %4701 = vrot.lane.b32.xlu0 %v4700_v24, %s5094_s25  ;;  %v4176_v24 = vld [vmem:[%s6861_s2 + $0x288] sm:$0xff]  ;;  %v1202_v42 = vpop.permute.xlu0 %1201 }
  0xdf   : > { %1633 = vrot.lane.b32.xlu1 %v4141_v44, %s5096_s4  ;;  %1225 = vrot.lane.b32.xlu0 %v4120_v45, %s5092_s8  ;;  %v4725_v44 = vpack.i.bf16 %v857_v40, %v852_v39  ;;  %v5636_v45 = vpop.permute.xlu1 %1207 }
  0xe3   : > { %1637 = vrot.lane.b32.xlu1 %v4143_v46, %s5096_s4  ;;  %1229 = vrot.lane.b32.xlu0 %v4122_v48, %s5092_s8  ;;  %v4178_v46 = vld [vmem:[%s6861_s2 + $0x298] sm:$0xff]  ;;  %v1206_v48 = vpop.permute.xlu0 %1205 }
  0xe4   : > { %v1268_v19 = vmul.f32 %v1206_v48, %v5356_v49 }
  0xe7   : > { %1641 = vrot.lane.b32.xlu1 %v4145_v52, %s5096_s4  ;;  %1623 = vrot.lane.b32.xlu0 %v4136_v53, %s5096_s4  ;;  %v4180_v52 = vld [vmem:[%s6861_s2 + $0x2a8] sm:$0xff]  ;;  %v1212_v53 = vpop.permute.xlu1 %1211 }
  0xeb   : > { %1645 = vrot.lane.b32.xlu1 %v4147_v54, %s5096_s4  ;;  %1627 = vrot.lane.b32.xlu0 %v4138_v60, %s5096_s4  ;;  %v818_v54 = vsel %vm809_vm1, %v798_v8, %v5568_v3  ;;  %v821_v60 = vsel %vm809_vm1, %v806_v28, %v808_v18  ;;  %v1210_v8 = vpop.permute.xlu0 %1209 }
  0xef   : > { %1649 = vrot.lane.b32.xlu1 %v4149_v5, %s5096_s4  ;;  %1631 = vrot.lane.b32.xlu0 %v4140_v47, %s5096_s4  ;;  %v4182_v5 = vld [vmem:[%s6861_s2 + $0x2b8] sm:$0xff]  ;;  %v855_v47 = vmul.f32 %v818_v54, %v5478_v13  ;;  %v1214_v22 = vpop.permute.xlu0 %1213 }
  0xf0   : > { %v1273_v28 = vmul.f32 %v1214_v22, %v5458_v55 }
  0xf1   : > { %v4710_v3 = vpack.i.bf16 %v856_v9, %v855_v47 }
  0xf3   : > { %2254 = vrot.lane.b32.xlu1 %v4175_v10, %s5097_s9  ;;  %1635 = vrot.lane.b32.xlu0 %v4142_v58, %s5096_s4  ;;  %v860_v10 = vmul.f32 %v821_v60, %v5431_v30  ;;  %v861_v58 = vmul.f32 %v808_v18, %v5428_v29  ;;  %v1218_v39 = vpop.permute.xlu0 %1217  ;;  %v4207_v60 = vld [vmem:[%s6861_s2 + $0x320] sm:$0xff] }
  0xf5   : > { %v4720_v18 = vpack.i.bf16 %v861_v58, %v860_v10  ;;  %v4209_v58 = vld [vmem:[%s6861_s2 + $0x330] sm:$0xff] }
  0xf7   : > { %2258 = vrot.lane.b32.xlu1 %v4177_v14, %s5097_s9  ;;  %1639 = vrot.lane.b32.xlu0 %v4144_v17, %s5096_s4  ;;  %v5667_v14 = vpop.permute.xlu1 %1215  ;;  %v1234_v17 = vsel %vm1231_vm2, %v5625_v38, %v1206_v48  ;;  %v5725_v54 = vpop.permute.xlu0 %1221 }
  0xf8   : > { %v1238_v10 = vsel %vm1231_vm2, %v5667_v14, %v1218_v39 }
  0xfb   : > { %2262 = vrot.lane.b32.xlu1 %v4179_v25, %s5097_s9  ;;  %1643 = vrot.lane.b32.xlu0 %v4146_v59, %s5096_s4  ;;  %v1267_v25 = vmul.f32 %v1234_v17, %v5383_v2  ;;  %v1237_v59 = vsel %vm1231_vm2, %v1212_v53, %v1214_v22  ;;  %v5682_v27 = vpop.permute.xlu1 %1219  ;;  %v1269_v17 = vmul.f32 %v5636_v45, %v5359_v51 }
  0xff   : > { %2266 = vrot.lane.b32.xlu1 %v4181_v32, %s5097_s9  ;;  %1647 = vrot.lane.b32.xlu0 %v4148_v15, %s5096_s4  ;;  %v4735_v32 = vpack.i.bf16 %v1268_v19, %v1267_v25  ;;  %v1272_v15 = vmul.f32 %v1237_v59, %v5461_v56  ;;  %v5693_v7 = vpop.permute.xlu1 %1223  ;;  %v1275_v19 = vmul.f32 %v1238_v10, %v5415_v21 }
 0x101   : > { %v4745_v6 = vpack.i.bf16 %v1273_v28, %v1272_v15 }
 0x103   : > { %4706 = vrot.lane.b32.xlu1 %v4705_v36, %s5094_s25  ;;  %1651 = vrot.lane.b32.xlu0 %v4150_v37, %s5096_s4  ;;  %v4203_v36 = vld [vmem:[%s6861_s2 + $0x300] sm:$0xff] }
 0x104   : > { %v4187_v37 = vld [vmem:[%s6861_s2 + $0x2e0] sm:$0xff] }
 0x107   : > { %4716 = vrot.lane.b32.xlu1 %v4715_v41, %s5094_s25  ;;  %2256 = vrot.lane.b32.xlu0 %v4176_v24, %s5097_s9  ;;  %v1232_v41 = vsel %vm1231_vm2, %v5608_v31, %v1202_v42  ;;  %v1233_v24 = vsel %vm1231_vm2, %v1202_v42, %v5625_v38  ;;  %v1235_v38 = vsel %vm1231_vm2, %v5636_v45, %v1210_v8 }
 0x108   : > { %v1265_v48 = vmul.f32 %v1232_v41, %v5439_v35  ;;  %v1236_v42 = vsel %vm1231_vm2, %v1210_v8, %v1212_v53  ;;  %v1239_v53 = vsel %vm1231_vm2, %v1218_v39, %v5682_v27  ;;  %v1264_v8 = vmul.f32 %v5608_v31, %v5448_v43  ;;  %v4206_v41 = vld [vmem:[%s6861_s2 + $0x318] sm:$0xff] }
 0x109   : > { %v1271_v47 = vmul.f32 %v1236_v42, %v5399_v12  ;;  %v1276_v22 = vmul.f32 %v1239_v53, %v5475_v11 }
 0x10a   : > { %v4750_v31 = vpack.i.bf16 %v1269_v17, %v1264_v8 }
 0x10b   : > { %4726 = vrot.lane.b32.xlu1 %v4725_v44, %s5094_s25  ;;  %2260 = vrot.lane.b32.xlu0 %v4178_v46, %s5097_s9  ;;  %v4205_v44 = vld [vmem:[%s6861_s2 + $0x310] sm:$0xff] }
 0x10c   : > { %v4189_v46 = vld [vmem:[%s6861_s2 + $0x2f0] sm:$0xff] }
 0x10f   : > { %2272 = vrot.lane.b32.xlu1 %v4184_v50, %s5097_s9  ;;  %2264 = vrot.lane.b32.xlu0 %v4180_v52, %s5097_s9  ;;  %v1266_v50 = vmul.f32 %v1233_v24, %v5387_v4 }
 0x113   : > { %2276 = vrot.lane.b32.xlu1 %v4186_v1, %s5097_s9  ;;  %2268 = vrot.lane.b32.xlu0 %v4182_v5, %s5097_s9  ;;  %v4730_v1 = vpack.i.bf16 %v1266_v50, %v1265_v48  ;;  %v1270_v5 = vmul.f32 %v1235_v38, %v5407_v16 }
 0x117   : > { %2280 = vrot.lane.b32.xlu1 %v4188_v57, %s5097_s9  ;;  %4711 = vrot.lane.b32.xlu0 %v4710_v3, %s5094_s25  ;;  %v4740_v57 = vpack.i.bf16 %v1271_v47, %v1270_v5  ;;  %v4632_v3 = vpop.permute.xlu0 %4631  ;;  %v1240_v47 = vsel %vm1231_vm2, %v5682_v27, %v5725_v54 }
 0x118   : > { %v4633_v50 = vunpack.i.l.bf16 %v4632_v3 }
 0x11b   : > { %2284 = vrot.lane.b32.xlu1 %v4190_v63, %s5097_s9  ;;  %4721 = vrot.lane.b32.xlu0 %v4720_v18, %s5094_s25  ;;  %v4755_v18 = vpack.i.bf16 %v1276_v22, %v1275_v19 }
 0x11f   : > { %4736 = vrot.lane.b32.xlu1 %v4735_v32, %s5098_s28  ;;  %2270 = vrot.lane.b32.xlu0 %v4183_v33, %s5097_s9  ;;  %v4204_v32 = vld [vmem:[%s6861_s2 + $0x308] sm:$0xff] }
 0x123   : > { %4746 = vrot.lane.b32.xlu1 %v4745_v6, %s5098_s28  ;;  %2274 = vrot.lane.b32.xlu0 %v4185_v23, %s5097_s9  ;;  %v4634_v6 = vunpack.i.h.bf16 %v4632_v3 }
 0x125   : > { %v5706_v40 = vpop.permute.xlu1 %4636 }
 0x127   : > { %2674 = vrot.lane.b32.xlu1 %v4203_v36, %s5098_s28  ;;  %2278 = vrot.lane.b32.xlu0 %v4187_v37, %s5097_s9 }
 0x129   : > { %v4652_v52 = vpop.permute.xlu1 %4651 }
 0x12a   : > { %v4653_v23 = vunpack.i.l.bf16 %v4652_v52  ;;  %v4654_v39 = vunpack.i.h.bf16 %v4652_v52 }
 0x12b   : > { %2678 = vrot.lane.b32.xlu1 %v4205_v44, %s5098_s28  ;;  %2282 = vrot.lane.b32.xlu0 %v4189_v46, %s5097_s9 }
 0x12c   : > { %v507_v10 = vsel %vm504_vm3, %v4653_v23, %v4654_v39 }
 0x12d   : > { %v4657_v9 = vpop.permute.xlu1 %4656 }
 0x12e   : > { %v4659_v45 = vunpack.i.h.bf16 %v4657_v9  ;;  %v4658_v28 = vunpack.i.l.bf16 %v4657_v9  ;;  %v508_v9 = vsel %vm504_vm3, %v4654_v39, %v4633_v50 }
 0x12f   : > { %2682 = vrot.lane.b32.xlu1 %v4207_v60, %s5098_s28  ;;  %4731 = vrot.lane.b32.xlu0 %v4730_v1, %s5098_s28 }
 0x130   : > { %v510_v44 = vsel %vm504_vm3, %v4658_v28, %v4659_v45  ;;  %v509_v48 = vsel %vm504_vm3, %v4634_v6, %v4658_v28 }
 0x131   : > { %v5749_v25 = vpop.permute.xlu1 %4666 }
 0x133   : > { %2686 = vrot.lane.b32.xlu1 %v4209_v58, %s5098_s28  ;;  %4741 = vrot.lane.b32.xlu0 %v4740_v57, %s5098_s28  ;;  %v4208_v58 = vld [vmem:[%s6861_s2 + $0x328] sm:$0xff] }
 0x135   : > { %v5753_v59 = vpop.permute.xlu0 %4641  ;;  %v5755_v63 = vpop.permute.xlu1 %4681 }
 0x136   : > { %v4684_v53 = vunpack.i.h.bf16 %v5755_v63  ;;  %v4683_v8 = vunpack.i.l.bf16 %v5755_v63  ;;  %v4638_v63 = vunpack.i.l.bf16 %v5706_v40 }
 0x137   : > { %4756 = vrot.lane.b32.xlu1 %v4755_v18, %s5098_s28  ;;  %4751 = vrot.lane.b32.xlu0 %v4750_v31, %s5098_s28  ;;  %v1278_v31 = vmul.f32 %v5725_v54, %v5373_v62  ;;  %v1277_v18 = vmul.f32 %v1240_v47, %v5478_v13 }
 0x138   : > { %v520_v54 = vsel %vm504_vm3, %v4683_v8, %v4684_v53 }
 0x139   : > { %v5762_v15 = vpop.permute.xlu1 %4691  ;;  %v4647_v33 = vpop.permute.xlu0 %4646  ;;  %v4760_v39 = vpack.i.bf16 %v1278_v31, %v1277_v18  ;;  %v440_v31 = vld [vmem:[%s6860_s1] sm:$0xff] }
 0x13a   : > { %v4649_v36 = vunpack.i.h.bf16 %v4647_v33  ;;  %v4648_v37 = vunpack.i.l.bf16 %v4647_v33  ;;  %v4668_v33 = vunpack.i.l.bf16 %v5749_v25  ;;  %v4693_v53 = vunpack.i.l.bf16 %v5762_v15 }
 0x13b   : > { %2676 = vrot.lane.b32.xlu0 %v4204_v32, %s5098_s28  ;;  %v4669_v32 = vunpack.i.h.bf16 %v5749_v25  ;;  %v4639_v25 = vunpack.i.h.bf16 %v5706_v40 }
 0x13c   : > { %v506_v24 = vsel %vm504_vm3, %v4649_v36, %v4653_v23  ;;  %v505_v46 = vsel %vm504_vm3, %v4648_v37, %v4649_v36 }
 0x13d   : > { %v5772_v38 = vpop.permute.xlu1 %4696  ;;  %v4662_v42 = vpop.permute.xlu0 %4661  ;;  %v4292_v52 = vpack.c.bf16 %v510_v44, %v506_v24  ;;  %v4294_v60 = vpack.c.bf16 %v509_v48, %v505_v46  ;;  %v513_v50 = vsel %vm504_vm3, %v4668_v33, %v4669_v32 }
 0x13e   : > { %v4664_v1 = vunpack.i.h.bf16 %v4662_v42  ;;  %v4663_v5 = vunpack.i.l.bf16 %v4662_v42  ;;  %v4699_v44 = vunpack.i.h.bf16 %v5772_v38  ;;  %v4698_v46 = vunpack.i.l.bf16 %v5772_v38 }
 0x13f   : > { %2680 = vrot.lane.b32.xlu0 %v4206_v41, %s5098_s28  ;;  %4293 = vmatprep.subr.bf16.mxu0 %v4292_v52 }
 0x140   : > { %4295 = vmatpush1.bf16.msra.mxu0 %v4294_v60  ;;  %v512_v17 = vsel %vm504_vm3, %v4663_v5, %v4664_v1  ;;  %v511_v27 = vsel %vm504_vm3, %v4659_v45, %v4663_v5  ;;  %v4210_v45 = vld [vmem:[%s6861_s2 + $0x338] sm:$0xff]  ;;  %v4644_v1 = vunpack.i.h.bf16 %v5753_v59 }
 0x141   : > { %v5787_v57 = vpop.permute.xlu1 %1227  ;;  %v4672_v3 = vpop.permute.xlu0 %4671  ;;  %v4300_v19 = vpack.c.bf16 %v512_v17, %v508_v9  ;;  %v4302_v22 = vpack.c.bf16 %v511_v27, %v507_v10  ;;  %v4694_v27 = vunpack.i.h.bf16 %v5762_v15 }
 0x142   : > { %v4674_v28 = vunpack.i.h.bf16 %v4672_v3  ;;  %v4673_v6 = vunpack.i.l.bf16 %v4672_v3  ;;  %v932_v3 = vsel %vm927_vm4, %v4644_v1, %v4698_v46 }
 0x143   : > { %2684 = vrot.lane.b32.xlu0 %v4208_v58, %s5098_s28  ;;  %4301 = vmatprep.subr.bf16.mxu1 %v4300_v19 }
 0x144   : > { %4303 = vmatpush1.bf16.msra.mxu1 %v4302_v22  ;;  %v516_v62 = vsel %vm504_vm3, %v4674_v28, %v4638_v63  ;;  %v514_v48 = vsel %vm504_vm3, %v4669_v32, %v4673_v6  ;;  %v515_v52 = vsel %vm504_vm3, %v4673_v6, %v4674_v28  ;;  %v933_v22 = vsel %vm927_vm4, %v4698_v46, %v4699_v44 }
 0x145   : > { %v5801_v23 = vpop.permute.xlu1 %1621  ;;  %v4677_v36 = vpop.permute.xlu0 %4676  ;;  %v4304_v37 = vpack.c.bf16 %v520_v54, %v516_v62  ;;  %v4643_v32 = vunpack.i.l.bf16 %v5753_v59 }
 0x146   : > { %v4679_v41 = vunpack.i.h.bf16 %v4677_v36  ;;  %v4678_v24 = vunpack.i.l.bf16 %v4677_v36 }
 0x147   : > { %2688 = vrot.lane.b32.xlu0 %v4210_v45, %s5098_s28  ;;  %4305 = vmatprep.subr.bf16.mxu1 %v4304_v37  ;;  %v930_v45 = vsel %vm927_vm4, %v4693_v53, %v4694_v27  ;;  %v931_v54 = vsel %vm927_vm4, %v4694_v27, %v4643_v32  ;;  %v4214_v27 = vld [vmem:[%s6861_s2 + $0x358] sm:$0xff] }
 0x148   : > { %v518_v42 = vsel %vm504_vm3, %v4678_v24, %v4679_v41  ;;  %v519_v60 = vsel %vm504_vm3, %v4679_v41, %v4683_v8  ;;  %v517_v40 = vsel %vm504_vm3, %v4639_v25, %v4678_v24 }
 0x149   : > { %v5814_v5 = vpop.permute.xlu1 %1625  ;;  %v4687_v38 = vpop.permute.xlu0 %4686  ;;  %v4296_v47 = vpack.c.bf16 %v518_v42, %v514_v48  ;;  %v4306_v9 = vpack.c.bf16 %v519_v60, %v515_v52  ;;  %v4298_v10 = vpack.c.bf16 %v517_v40, %v513_v50  ;;  %v1274_v50 = vmul.f32 %v5667_v14, %v5412_v20  ;;  %v442_v20 = vld [vmem:[%s6860_s1 + $0x10] sm:$0xff] }
 0x14a   : > { %v4689_v58 = vunpack.i.h.bf16 %v4687_v38  ;;  %v4688_v17 = vunpack.i.l.bf16 %v4687_v38  ;;  %v1279_v42 = vmul.f32 %v5693_v7, %v5378_v0 }
 0x14b   : > { %4761 = vrot.lane.b32.xlu0 %v4760_v39, %s5098_s28  ;;  %4297 = vmatprep.subr.bf16.mxu0 %v4296_v47 }
 0x14c   : > { %v928_v8 = vsel %vm927_vm4, %v4688_v17, %v4689_v58  ;;  %4307 = vmatpush1.bf16.msra.mxu1 %v4306_v9  ;;  %4299 = vmatpush1.bf16.msra.mxu0 %v4298_v10  ;;  %v929_v19 = vsel %vm927_vm4, %v4689_v58, %v4693_v53  ;;  %v4775_v0 = vpack.i.bf16 %v1279_v42, %v1274_v50  ;;  %v443_v9 = vld [vmem:[%s6860_s1 + $0x18] sm:$0xff]  ;;  %v4212_v10 = vld [vmem:[%s6861_s2 + $0x348] sm:$0xff]  ;;  %v4211_v53 = vld [vmem:[%s6861_s2 + $0x340] sm:$0xff] }
 0x14d   : > { %v5826_v18 = vpop.permute.xlu1 %1629  ;;  %v4702_v15 = vpop.permute.xlu0 %4701  ;;  %v4308_v63 = vpack.c.bf16 %v933_v22, %v929_v19  ;;  %v4310_v28 = vpack.c.bf16 %v932_v3, %v928_v8  ;;  %v4213_v3 = vld [vmem:[%s6861_s2 + $0x350] sm:$0xff]  ;;  %v4216_v22 = vld [vmem:[%s6861_s2 + $0x368] sm:$0xff] }
 0x14e   : > { %v4704_v33 = vunpack.i.h.bf16 %v4702_v15  ;;  %v4703_v6 = vunpack.i.l.bf16 %v4702_v15 }
 0x14f   : > { %4309 = vmatprep.subr.bf16.mxu0 %v4308_v63  ;;  %4071 = vmatmul.mubr.msk.f32.vlgmr.msra.gmra.mrb[0].mxu0 %vm537_vm5, %v440_v31 }
 0x150   : > { %v934_v62 = vsel %vm927_vm4, %v4699_v44, %v4703_v6  ;;  %4311 = vmatpush1.bf16.msra.mxu0 %v4310_v28  ;;  %v935_v36 = vsel %vm927_vm4, %v4703_v6, %v4704_v33  ;;  %4075 = vmatmul.mubr.msk.f32.vlgmr.msra.gmra.mrb[0].mxu1 %vm537_vm5, %v440_v31  ;;  %v441_v44 = vld [vmem:[%s6860_s1 + $0x8] sm:$0xff]  ;;  %v4215_v31 = vld [vmem:[%s6861_s2 + $0x360] sm:$0xff] }
 0x151   : > { %v5835_v37 = vpop.permute.xlu1 %1633  ;;  %v1226_v39 = vpop.permute.xlu0 %1225  ;;  %v4316_v59 = vpack.c.bf16 %v935_v36, %v931_v54  ;;  %v4318_v25 = vpack.c.bf16 %v934_v62, %v930_v45  ;;  %709 = vmatprep.mubr.f32.mxu1 %v5095_v34  ;;  %620 = vmatprep.mubr.f32.mxu0 %v5095_v34  ;;  %v4218_v45 = vld [vmem:[%s6861_s2 + $0x378] sm:$0xff]  ;;  %v4217_v62 = vld [vmem:[%s6861_s2 + $0x370] sm:$0xff] }
 0x152   : > { %v1241_v41 = vsel %vm1231_vm2, %v5693_v7, %v1226_v39  ;;  %v1242_v24 = vsel %vm1231_vm2, %v1226_v39, %v5787_v57 }
 0x153   : > { %v1280_v46 = vmul.f32 %v1241_v41, %v5500_v61  ;;  %v1281_v48 = vmul.f32 %v1242_v24, %v5492_v26  ;;  %4317 = vmatprep.subr.bf16.mxu1 %v4316_v59  ;;  %4072 = vmatmul.mubr.msk.f32.gmra.mrb[2].mxu0 %vm537_vm5, %v441_v44 }
 0x154   : > { %4319 = vmatpush1.bf16.msra.mxu1 %v4318_v25  ;;  %626 = vmatprep.mubr.f32.mxu0 %v5095_v34 }
 0x155   : > { %v4765_v52 = vpack.i.bf16 %v1281_v48, %v1280_v46  ;;  %v5854_v60 = vpop.permute.xlu1 %1637  ;;  %v1230_v40 = vpop.permute.xlu0 %1229  ;;  %4076 = vmatmul.mubr.msk.f32.gmra.mrb[2].mxu1 %vm537_vm5, %v441_v44 }
 0x156   : > { %v1243_v1 = vsel %vm1231_vm2, %v5787_v57, %v1230_v40  ;;  %v1283_v38 = vmul.f32 %v1230_v40, %v5428_v29  ;;  %715 = vmatprep.mubr.f32.mxu1 %v5095_v34 }
 0x157   : > { %v1282_v14 = vmul.f32 %v1243_v1, %v5431_v30  ;;  %4766 = vrot.lane.b32.xlu1 %v4765_v52, %s5098_s28  ;;  %4073 = vmatmul.mubr.msk.f32.gmra.mrb[4].mxu0 %vm537_vm5, %v442_v20 }
 0x158   : > { %632 = vmatprep.mubr.f32.mxu0 %v5095_v34 }
 0x159   : > { %v4770_v7 = vpack.i.bf16 %v1283_v38, %v1282_v14  ;;  %v5868_v47 = vpop.permute.xlu1 %1641  ;;  %v1624_v57 = vpop.permute.xlu0 %1623  ;;  %4077 = vmatmul.mubr.msk.f32.gmra.mrb[4].mxu1 %vm537_vm5, %v442_v20 }
 0x15a   : > { %721 = vmatprep.mubr.f32.mxu1 %v5095_v34  ;;  %v1654_v28 = vsel %vm1653_vm6, %v5801_v23, %v1624_v57  ;;  %v1655_v32 = vsel %vm1653_vm6, %v1624_v57, %v5814_v5 }
 0x15b   : > { %4776 = vrot.lane.b32.xlu1 %v4775_v0, %s5098_s28  ;;  %4771 = vrot.lane.b32.xlu0 %v4770_v7, %s5098_s28  ;;  %v1687_v54 = vmul.f32 %v1654_v28, %v5439_v35  ;;  %v1688_v36 = vmul.f32 %v1655_v32, %v5387_v4 }
 0x15c   : > { %4074 = vmatmul.mubr.msk.f32.gmra.mrb[6].mxu0 %vm537_vm5, %v443_v9 }
 0x15d   : > { %v5884_v58 = vpop.permute.xlu1 %1645  ;;  %v1628_v17 = vpop.permute.xlu0 %1627  ;;  %4078 = vmatmul.mubr.msk.f32.gmra.mrb[6].mxu1 %vm537_vm5, %v443_v9  ;;  %1036 = vmatprep.mubr.f32.mxu0 %v5095_v34  ;;  %v4234_v9 = vld [vmem:[%s6861_s2 + $0x398] sm:$0xff] }
 0x15e   : > { %1125 = vmatprep.mubr.f32.mxu1 %v5095_v34  ;;  %v1656_v33 = vsel %vm1653_vm6, %v5814_v5, %v1628_v17  ;;  %v1690_v39 = vmul.f32 %v1628_v17, %v5356_v49 }
 0x15f   : > { %2692 = vrot.lane.b32.xlu1 %v4212_v10, %s5098_s28  ;;  %2690 = vrot.lane.b32.xlu0 %v4211_v53, %s5098_s28  ;;  %v1689_v5 = vmul.f32 %v1656_v33, %v5383_v2  ;;  %v4780_v2 = vpack.i.bf16 %v1688_v36, %v1687_v54  ;;  %v4235_v10 = vld [vmem:[%s6861_s2 + $0x3a0] sm:$0xff] }
 0x161   : > { %v5897_v8 = vpop.permute.xlu1 %1649  ;;  %v1632_v19 = vpop.permute.xlu0 %1631  ;;  %v4785_v4 = vpack.i.bf16 %v1690_v39, %v1689_v5 }
 0x162   : > { %v1657_v41 = vsel %vm1653_vm6, %v5826_v18, %v1632_v19  ;;  %v1658_v24 = vsel %vm1653_vm6, %v1632_v19, %v5835_v37 }
 0x163   : > { %2696 = vrot.lane.b32.xlu1 %v4214_v27, %s5098_s28  ;;  %2694 = vrot.lane.b32.xlu0 %v4213_v3, %s5098_s28  ;;  %v1692_v49 = vmul.f32 %v1657_v41, %v5407_v16  ;;  %v1693_v35 = vmul.f32 %v1658_v24, %v5399_v12  ;;  %v4231_v12 = vld [vmem:[%s6861_s2 + $0x380] sm:$0xff]  ;;  %v4238_v41 = vld [vmem:[%s6861_s2 + $0x3b8] sm:$0xff] }
 0x164   : > { %v6025_v24 = vld [vmem:[%s5353_s24 + $0x80] sm:$0xff] }
 0x165   : > { %v5907_v15 = vpop.permute.xlu1 %2254  ;;  %v1636_v63 = vpop.permute.xlu0 %1635 }
 0x166   : > { %v1659_v6 = vsel %vm1653_vm6, %v5835_v37, %v1636_v63  ;;  %v1695_v46 = vmul.f32 %v1636_v63, %v5458_v55  ;;  %v1686_v55 = vmul.f32 %v5801_v23, %v5448_v43  ;;  %v4790_v37 = vpack.i.bf16 %v1693_v35, %v1692_v49  ;;  %v4232_v23 = vld [vmem:[%s6861_s2 + $0x388] sm:$0xff] }
 0x167   : > { %2700 = vrot.lane.b32.xlu1 %v4216_v22, %s5098_s28  ;;  %2698 = vrot.lane.b32.xlu0 %v4215_v31, %s5098_s28  ;;  %v1694_v44 = vmul.f32 %v1659_v6, %v5461_v56  ;;  %v1691_v56 = vmul.f32 %v5826_v18, %v5359_v51  ;;  %v4233_v18 = vld [vmem:[%s6861_s2 + $0x390] sm:$0xff] }
 0x169   : > { %v5929_v59 = vpop.permute.xlu1 %2258  ;;  %v1640_v25 = vpop.permute.xlu0 %1639  ;;  %v4795_v42 = vpack.i.bf16 %v1695_v46, %v1694_v44  ;;  %v4800_v40 = vpack.i.bf16 %v1691_v56, %v1686_v55 }
 0x16a   : > { %v1660_v17 = vsel %vm1653_vm6, %v5854_v60, %v1640_v25  ;;  %v1661_v27 = vsel %vm1653_vm6, %v1640_v25, %v5868_v47 }
 0x16b   : > { %2704 = vrot.lane.b32.xlu1 %v4218_v45, %s5098_s28  ;;  %2702 = vrot.lane.b32.xlu0 %v4217_v62, %s5098_s28  ;;  %v1697_v28 = vmul.f32 %v1660_v17, %v5415_v21  ;;  %v1698_v32 = vmul.f32 %v1661_v27, %v5475_v11  ;;  %v4236_v45 = vld [vmem:[%s6861_s2 + $0x3a8] sm:$0xff]  ;;  %v4237_v62 = vld [vmem:[%s6861_s2 + $0x3b0] sm:$0xff] }
 0x16d   : > { %v5941_v48 = vpop.permute.xlu1 %2262  ;;  %v1644_v50 = vpop.permute.xlu0 %1643  ;;  %v4805_v25 = vpack.i.bf16 %v1698_v32, %v1697_v28  ;;  %v4241_v28 = vld [vmem:[%s6861_s2 + $0x3d0] sm:$0xff] }
 0x16e   : > { %v1662_v11 = vsel %vm1653_vm6, %v5868_v47, %v1644_v50  ;;  %v1700_v44 = vmul.f32 %v6025_v24, %v1644_v50  ;;  %v5032_v50 = vld [vmem:[%s5353_s24 + $0x90] sm:$0xff] }
 0x16f   : > { %4781 = vrot.lane.b32.xlu0 %v4780_v2, %s5097_s9  ;;  %4786 = vrot.lane.b32.xlu1 %v4785_v4, %s5097_s9  ;;  %v1699_v47 = vmul.f32 %v1662_v11, %v5478_v13  ;;  %v6042_v13 = vld [vmem:[%s6860_s1 + $0x20] sm:$0xff] }
 0x170   : > { %v4243_v11 = vld [vmem:[%s6861_s2 + $0x3e0] sm:$0xff] }
 0x171   : > { %v5949_v52 = vpop.permute.xlu1 %2266  ;;  %v1648_v16 = vpop.permute.xlu0 %1647  ;;  %v4810_v55 = vpack.i.bf16 %v1700_v44, %v1699_v47  ;;  %v4245_v47 = vld [vmem:[%s6861_s2 + $0x3f0] sm:$0xff] }
 0x172   : > { %v1663_v5 = vsel %vm1653_vm6, %v5884_v58, %v1648_v16  ;;  %v1664_v39 = vsel %vm1653_vm6, %v1648_v16, %v5897_v8 }
 0x173   : > { %4791 = vrot.lane.b32.xlu0 %v4790_v37, %s5097_s9  ;;  %4796 = vrot.lane.b32.xlu1 %v4795_v42, %s5097_s9  ;;  %v1702_v46 = vmul.f32 %v1663_v5, %v5500_v61  ;;  %v1703_v2 = vmul.f32 %v1664_v39, %v5492_v26  ;;  %v5031_v61 = vld [vmem:[%s5353_s24 + $0x60] sm:$0xff]  ;;  %v1701_v42 = vmul.f32 %v5032_v50, %v5884_v58  ;;  %v4261_v50 = vld [vmem:[%s6861_s2 + $0x410] sm:$0xff] }
 0x174   : > { %v1696_v26 = vmul.f32 %v5031_v61, %v5854_v60  ;;  %v4096_v60 = vld [vmem:[%s6860_s1 + $0x28] sm:$0xff] }
 0x175   : > { %v5956_v1 = vpop.permute.xlu1 %4706  ;;  %v5958_v38 = vpop.permute.xlu0 %1651 }
 0x176   : > { %v4709_v43 = vunpack.i.h.bf16 %v5956_v1  ;;  %v4708_v51 = vunpack.i.l.bf16 %v5956_v1  ;;  %v1665_v35 = vsel %vm1653_vm6, %v5897_v8, %v5958_v38  ;;  %v4815_v8 = vpack.i.bf16 %v1703_v2, %v1702_v46  ;;  %v4260_v46 = vld [vmem:[%s6861_s2 + $0x408] sm:$0xff]  ;;  %v4259_v2 = vld [vmem:[%s6861_s2 + $0x400] sm:$0xff] }
 0x177   : > { %4801 = vrot.lane.b32.xlu0 %v4800_v40, %s5097_s9  ;;  %3094 = vrot.lane.b32.xlu1 %v4231_v12, %s5094_s25  ;;  %v1704_v56 = vmul.f32 %v1665_v35, %v5431_v30  ;;  %v1705_v37 = vmul.f32 %v5958_v38, %v5428_v29  ;;  %v4825_v30 = vpack.i.bf16 %v1701_v42, %v1696_v26  ;;  %v4262_v26 = vld [vmem:[%s6861_s2 + $0x418] sm:$0xff] }
 0x178   : > { %v937_v57 = vsel %vm927_vm4, %v4708_v51, %v4709_v43 }
 0x179   : > { %v5970_v20 = vpop.permute.xlu1 %4716  ;;  %v5972_v14 = vpop.permute.xlu0 %2256 }
 0x17a   : > { %v4719_v0 = vunpack.i.h.bf16 %v5970_v20  ;;  %v4718_v7 = vunpack.i.l.bf16 %v5970_v20 }
 0x17b   : > { %3096 = vrot.lane.b32.xlu0 %v4232_v23, %s5094_s25  ;;  %3098 = vrot.lane.b32.xlu1 %v4233_v18, %s5094_s25 }
 0x17c   : > { %v941_v53 = vsel %vm927_vm4, %v4718_v7, %v4719_v0 }
 0x17d   : > { %v4727_v3 = vpop.permute.xlu1 %4726  ;;  %v5994_v19 = vpop.permute.xlu0 %2260  ;;  %v4312_v22 = vpack.c.bf16 %v941_v53, %v937_v57  ;;  %v4239_v53 = vld [vmem:[%s6861_s2 + $0x3c0] sm:$0xff] }
 0x17e   : > { %v4729_v31 = vunpack.i.h.bf16 %v4727_v3  ;;  %v4728_v63 = vunpack.i.l.bf16 %v4727_v3 }
 0x17f   : > { %3100 = vrot.lane.b32.xlu0 %v4234_v9, %s5094_s25  ;;  %3102 = vrot.lane.b32.xlu1 %v4235_v10, %s5094_s25  ;;  %v4240_v10 = vld [vmem:[%s6861_s2 + $0x3c8] sm:$0xff] }
 0x180   : > { %v936_v33 = vsel %vm927_vm4, %v4728_v63, %v4708_v51  ;;  %v940_v6 = vsel %vm927_vm4, %v4729_v31, %v4718_v7  ;;  %4313 = vmatprep.subr.bf16.mxu0 %v4312_v22  ;;  %v4820_v51 = vpack.i.bf16 %v1705_v37, %v1704_v56  ;;  %v4097_v7 = vld [vmem:[%s6860_s1 + $0x30] sm:$0xff]  ;;  %v4098_v31 = vld [vmem:[%s6860_s1 + $0x38] sm:$0xff] }
 0x181   : > { %v6008_v54 = vpop.permute.xlu1 %2272  ;;  %v6010_v36 = vpop.permute.xlu0 %2264  ;;  %v4314_v21 = vpack.c.bf16 %v940_v6, %v936_v33  ;;  %v4242_v63 = vld [vmem:[%s6861_s2 + $0x3d8] sm:$0xff] }
 0x183   : > { %3104 = vrot.lane.b32.xlu0 %v4236_v45, %s5094_s25  ;;  %3106 = vrot.lane.b32.xlu1 %v4237_v62, %s5094_s25 }
 0x184   : > { %4315 = vmatpush1.bf16.msra.mxu0 %v4314_v21  ;;  %v4244_v21 = vld [vmem:[%s6861_s2 + $0x3e8] sm:$0xff] }
 0x185   : > { %v6030_v4 = vpop.permute.xlu1 %2276  ;;  %v6032_v49 = vpop.permute.xlu0 %2268 }
 0x187   : > { %3108 = vrot.lane.b32.xlu0 %v4238_v41, %s5094_s25  ;;  %4806 = vrot.lane.b32.xlu1 %v4805_v25, %s5097_s9  ;;  %v4246_v41 = vld [vmem:[%s6861_s2 + $0x3f8] sm:$0xff] }
 0x188   : > { %4099 = vmatmul.mubr.msk.f32.vlgmr.msra.gmra.mrb[0].mxu0 %vm537_vm5, %v6042_v13 }
 0x189   : > { %v6053_v16 = vpop.permute.xlu1 %2280  ;;  %v4712_v12 = vpop.permute.xlu0 %4711  ;;  %1042 = vmatprep.mubr.f32.mxu0 %v5095_v34 }
 0x18a   : > { %v4714_v58 = vunpack.i.h.bf16 %v4712_v12  ;;  %v4713_v40 = vunpack.i.l.bf16 %v4712_v12  ;;  %v4264_v12 = vld [vmem:[%s6861_s2 + $0x428] sm:$0xff] }
 0x18b   : > { %4811 = vrot.lane.b32.xlu0 %v4810_v55, %s5097_s9  ;;  %4816 = vrot.lane.b32.xlu1 %v4815_v8, %s5097_s9 }
 0x18c   : > { %4100 = vmatmul.mubr.msk.f32.gmra.mrb[2].mxu0 %vm537_vm5, %v4096_v60  ;;  %v938_v57 = vsel %vm927_vm4, %v4709_v43, %v4713_v40  ;;  %v939_v17 = vsel %vm927_vm4, %v4713_v40, %v4714_v58 }
 0x18d   : > { %v6062_v29 = vpop.permute.xlu1 %2284  ;;  %v4722_v38 = vpop.permute.xlu0 %4721  ;;  %1048 = vmatprep.mubr.f32.mxu0 %v5095_v34 }
 0x18e   : > { %v4724_v23 = vunpack.i.h.bf16 %v4722_v38  ;;  %v4723_v18 = vunpack.i.l.bf16 %v4722_v38 }
 0x18f   : > { %4826 = vrot.lane.b32.xlu1 %v4825_v30, %s5097_s9  ;;  %4821 = vrot.lane.b32.xlu0 %v4820_v51, %s5097_s9 }
 0x190   : > { %v942_v9 = vsel %vm927_vm4, %v4719_v0, %v4723_v18  ;;  %v943_v27 = vsel %vm927_vm4, %v4723_v18, %v4724_v23  ;;  %4101 = vmatmul.mubr.msk.f32.gmra.mrb[4].mxu0 %vm537_vm5, %v4097_v7 }
 0x191   : > { %v4737_v1 = vpop.permute.xlu1 %4736  ;;  %v6085_v43 = vpop.permute.xlu0 %2270  ;;  %v4320_v20 = vpack.c.bf16 %v943_v27, %v939_v17  ;;  %v4322_v3 = vpack.c.bf16 %v942_v9, %v938_v57  ;;  %1054 = vmatprep.mubr.f32.mxu0 %v5095_v34  ;;  %v4266_v9 = vld [vmem:[%s6861_s2 + $0x438] sm:$0xff] }
 0x192   : > { %v4739_v0 = vunpack.i.h.bf16 %v4737_v1  ;;  %v4738_v22 = vunpack.i.l.bf16 %v4737_v1  ;;  %v4268_v1 = vld [vmem:[%s6861_s2 + $0x448] sm:$0xff] }
 0x193   : > { %3112 = vrot.lane.b32.xlu1 %v4240_v10, %s5094_s25  ;;  %3110 = vrot.lane.b32.xlu0 %v4239_v53, %s5094_s25  ;;  %v4265_v10 = vld [vmem:[%s6861_s2 + $0x430] sm:$0xff] }
 0x194   : > { %4321 = vmatprep.subr.bf16.mxu1 %v4320_v20  ;;  %4102 = vmatmul.mubr.msk.f32.gmra.mrb[6].mxu0 %vm537_vm5, %v4098_v31  ;;  %v1353_v62 = vsel %vm1349_vm7, %v4738_v22, %v4739_v0  ;;  %v4267_v20 = vld [vmem:[%s6861_s2 + $0x440] sm:$0xff]  ;;  %v4270_v0 = vld [vmem:[%s6861_s2 + $0x458] sm:$0xff] }
 0x195   : > { %4323 = vmatpush1.bf16.msra.mxu1 %v4322_v3  ;;  %v4747_v32 = vpop.permute.xlu1 %4746  ;;  %v6100_v33 = vpop.permute.xlu0 %2274  ;;  %1458 = vmatprep.mubr.f32.mxu0 %v5095_v34 }
 0x196   : > { %v4749_v6 = vunpack.i.h.bf16 %v4747_v32  ;;  %v4748_v45 = vunpack.i.l.bf16 %v4747_v32  ;;  %v2286_v32 = vsel %vm1771_vm8, %v5907_v15, %v5972_v14 }
 0x197   : > { %3116 = vrot.lane.b32.xlu1 %v4242_v63, %s5094_s25  ;;  %3114 = vrot.lane.b32.xlu0 %v4241_v28, %s5094_s25  ;;  %v4272_v63 = vld [vmem:[%s6861_s2 + $0x468] sm:$0xff]  ;;  %v4271_v28 = vld [vmem:[%s6861_s2 + $0x460] sm:$0xff] }
 0x198   : > { %v1357_v5 = vsel %vm1349_vm7, %v4748_v45, %v4749_v6  ;;  %4103 = vmatmul.mubr.msk.f32.vlgmr.msra.gmra.mrb[0].mxu1 %vm537_vm5, %v6042_v13 }
 0x199   : > { %v6115_v39 = vpop.permute.xlu0 %2278  ;;  %v4332_v25 = vpack.c.bf16 %v1357_v5, %v1353_v62  ;;  %1131 = vmatprep.mubr.f32.mxu1 %v5095_v34  ;;  %v6172_v53 = vpop.permute.xlu1 %2674  ;;  %v6213_v62 = vld [vmem:[%s5353_s24 + $0x28] sm:$0xff] }
 0x19b   : > { %3120 = vrot.lane.b32.xlu1 %v4244_v21, %s5094_s25  ;;  %3118 = vrot.lane.b32.xlu0 %v4243_v11, %s5094_s25  ;;  %v2288_v21 = vsel %vm1771_vm8, %v5929_v59, %v5994_v19  ;;  %v6221_v11 = vld [vmem:[%s5353_s24 + $0x10] sm:$0xff] }
 0x19c   : > { %4333 = vmatprep.subr.bf16.mxu1 %v4332_v25  ;;  %4104 = vmatmul.mubr.msk.f32.gmra.mrb[2].mxu1 %vm537_vm5, %v4096_v60  ;;  %v4263_v60 = vld [vmem:[%s6861_s2 + $0x420] sm:$0xff]  ;;  %v2319_v5 = vmul.f32 %v6221_v11, %v2286_v32  ;;  %v2290_v25 = vsel %vm1771_vm8, %v6010_v36, %v5949_v52 }
 0x19d   : > { %v6127_v44 = vpop.permute.xlu0 %2282  ;;  %1137 = vmatprep.mubr.f32.mxu1 %v5095_v34  ;;  %v6184_v3 = vpop.permute.xlu1 %2678 }
 0x19f   : > { %3124 = vrot.lane.b32.xlu1 %v4246_v41, %s5094_s25  ;;  %3122 = vrot.lane.b32.xlu0 %v4245_v47, %s5094_s25  ;;  %v4273_v47 = vld [vmem:[%s6861_s2 + $0x470] sm:$0xff] }
 0x1a0   : > { %4105 = vmatmul.mubr.msk.f32.gmra.mrb[4].mxu1 %vm537_vm5, %v4097_v7 }
 0x1a1   : > { %v4732_v35 = vpop.permute.xlu0 %4731  ;;  %1143 = vmatprep.mubr.f32.mxu1 %v5095_v34  ;;  %v6207_v6 = vpop.permute.xlu1 %2682 }
 0x1a2   : > { %v4734_v13 = vunpack.i.h.bf16 %v4732_v35  ;;  %v4733_v61 = vunpack.i.l.bf16 %v4732_v35  ;;  %v6243_v35 = vld [vmem:[%s5353_s24 + $0x20] sm:$0xff] }
 0x1a3   : > { %3516 = vrot.lane.b32.xlu1 %v4260_v46, %s5093_s13  ;;  %3514 = vrot.lane.b32.xlu0 %v4259_v2, %s5093_s13  ;;  %v6239_v46 = vld [vmem:[%s5353_s24 + $0x18] sm:$0xff] }
 0x1a4   : > { %4106 = vmatmul.mubr.msk.f32.gmra.mrb[6].mxu1 %vm537_vm5, %v4098_v31  ;;  %v1352_v56 = vsel %vm1349_vm7, %v4734_v13, %v4738_v22  ;;  %v1351_v58 = vsel %vm1349_vm7, %v4733_v61, %v4734_v13  ;;  %v4269_v22 = vld [vmem:[%s6861_s2 + $0x450] sm:$0xff]  ;;  %v2321_v13 = vmul.f32 %v6243_v35, %v2288_v21 }
 0x1a5   : > { %v4742_v42 = vpop.permute.xlu0 %4741  ;;  %1547 = vmatprep.mubr.f32.mxu1 %v5095_v34 }
 0x1a6   : > { %v4744_v55 = vunpack.i.h.bf16 %v4742_v42  ;;  %v4743_v8 = vunpack.i.l.bf16 %v4742_v42 }
 0x1a7   : > { %3520 = vrot.lane.b32.xlu1 %v4262_v26, %s5093_s13  ;;  %3518 = vrot.lane.b32.xlu0 %v4261_v50, %s5093_s13  ;;  %v2291_v26 = vsel %vm1771_vm8, %v5949_v52, %v6032_v49  ;;  %v6255_v50 = vld [vmem:[%s5353_s24 + $0x40] sm:$0xff] }
 0x1a8   : > { %v1356_v37 = vsel %vm1349_vm7, %v4744_v55, %v4748_v45  ;;  %v1355_v40 = vsel %vm1349_vm7, %v4743_v8, %v4744_v55  ;;  %v2287_v45 = vsel %vm1771_vm8, %v5972_v14, %v5929_v59  ;;  %v2289_v14 = vsel %vm1771_vm8, %v5941_v48, %v6010_v36  ;;  %v4274_v59 = vld [vmem:[%s6861_s2 + $0x478] sm:$0xff]  ;;  %v6259_v55 = vld [vmem:[%s5353_s24 + $0x48] sm:$0xff] }
 0x1a9   : > { %v4752_v30 = vpop.permute.xlu0 %4751  ;;  %v4324_v51 = vpack.c.bf16 %v1355_v40, %v1351_v58  ;;  %v4334_v38 = vpack.c.bf16 %v1356_v37, %v1352_v56  ;;  %v2320_v2 = vmul.f32 %v6239_v46, %v2287_v45  ;;  %v2322_v36 = vmul.f32 %v5994_v19, %v6213_v62  ;;  %v6262_v56 = vpop.permute.xlu1 %2686  ;;  %v6267_v19 = vld [vmem:[%s5353_s24 + $0x50] sm:$0xff]  ;;  %v6273_v58 = vld [vmem:[%s5353_s24 + $0x88] sm:$0xff]  ;;  %v6331_v45 = vld [vmem:[%s5353_s24 + $0x98] sm:$0xff] }
 0x1aa   : > { %v4754_v23 = vunpack.i.h.bf16 %v4752_v30  ;;  %v4753_v18 = vunpack.i.l.bf16 %v4752_v30  ;;  %v2324_v42 = vmul.f32 %v6255_v50, %v2289_v14  ;;  %v2326_v52 = vmul.f32 %v6267_v19, %v2291_v26 }
 0x1ab   : > { %3524 = vrot.lane.b32.xlu1 %v4264_v12, %s5093_s13  ;;  %3522 = vrot.lane.b32.xlu0 %v4263_v60, %s5093_s13  ;;  %v4830_v12 = vpack.i.bf16 %v2320_v2, %v2319_v5  ;;  %v4835_v60 = vpack.i.bf16 %v2322_v36, %v2321_v13  ;;  %v2292_v40 = vsel %vm1771_vm8, %v6085_v43, %v6008_v54  ;;  %v6336_v5 = vld [vmem:[%s5353_s24 + $0xb0] sm:$0xff] }
 0x1ac   : > { %v1350_v7 = vsel %vm1349_vm7, %v4753_v18, %v4733_v61  ;;  %v1354_v57 = vsel %vm1349_vm7, %v4754_v23, %v4743_v8  ;;  %4325 = vmatprep.subr.bf16.mxu0 %v4324_v51  ;;  %4335 = vmatpush1.bf16.msra.mxu1 %v4334_v38  ;;  %v6249_v61 = vld [vmem:[%s5353_s24 + $0x58] sm:$0xff]  ;;  %v2325_v8 = vmul.f32 %v6259_v55, %v2290_v25 }
 0x1ad   : > { %v4326_v17 = vpack.c.bf16 %v1354_v57, %v1350_v7  ;;  %v6176_v27 = vpop.permute.xlu0 %2676  ;;  %v2327_v37 = vmul.f32 %v6032_v49, %v6249_v61  ;;  %v2294_v30 = vsel %vm1771_vm8, %v6100_v33, %v6030_v4  ;;  %v2293_v51 = vsel %vm1771_vm8, %v6008_v54, %v6100_v33  ;;  %v6287_v49 = vld [vmem:[%s5353_s24 + $0x8] sm:$0xff]  ;;  %v6292_v18 = vld [vmem:[%s5353_s24 + $0x38] sm:$0xff] }
 0x1ae   : > { %v2318_v23 = vmul.f32 %v6287_v49, %v5907_v15  ;;  %v2323_v7 = vmul.f32 %v6292_v18, %v5941_v48  ;;  %v4840_v57 = vpack.i.bf16 %v2325_v8, %v2324_v42  ;;  %v2332_v54 = vmul.f32 %v6030_v4, %v6273_v58  ;;  %v6304_v15 = vld [vmem:[%s5353_s24 + $0x70] sm:$0xff] }
 0x1af   : > { %3528 = vrot.lane.b32.xlu1 %v4266_v9, %s5093_s13  ;;  %3526 = vrot.lane.b32.xlu0 %v4265_v10, %s5093_s13  ;;  %v6297_v9 = vld [vmem:[%s5353_s24 + $0xb8] sm:$0xff]  ;;  %v4845_v33 = vpack.i.bf16 %v2327_v37, %v2326_v52  ;;  %v2329_v10 = vmul.f32 %v6304_v15, %v2292_v40  ;;  %v2297_v48 = vsel %vm1771_vm8, %v6127_v44, %v6062_v29 }
 0x1b0   : > { %4327 = vmatpush1.bf16.msra.mxu0 %v4326_v17  ;;  %v2331_v17 = vmul.f32 %v6025_v24, %v2294_v30  ;;  %v2295_v4 = vsel %vm1771_vm8, %v6115_v39, %v6053_v16  ;;  %v2333_v21 = vmul.f32 %v6331_v45, %v6115_v39  ;;  %v2336_v14 = vmul.f32 %v6336_v5, %v2297_v48 }
 0x1b1   : > { %v6194_v31 = vpop.permute.xlu0 %2680  ;;  %v4850_v39 = vpack.i.bf16 %v2323_v7, %v2318_v23  ;;  %v2706_v36 = vsel %vm1349_vm7, %v6172_v53, %v6176_v27  ;;  %v2707_v42 = vsel %vm1349_vm7, %v6176_v27, %v6184_v3 }
 0x1b2   : > { %v4860_v2 = vpack.i.bf16 %v2332_v54, %v2331_v17  ;;  %v2708_v8 = vsel %vm1349_vm7, %v6184_v3, %v6194_v31  ;;  %v2739_v23 = vmul.f32 %v6221_v11, %v2706_v36  ;;  %v2740_v3 = vmul.f32 %v6239_v46, %v2707_v42 }
 0x1b3   : > { %3532 = vrot.lane.b32.xlu1 %v4268_v1, %s5093_s13  ;;  %3530 = vrot.lane.b32.xlu0 %v4267_v20, %s5093_s13  ;;  %v6312_v1 = vld [vmem:[%s5353_s24 + $0x78] sm:$0xff]  ;;  %v2742_v54 = vmul.f32 %v6194_v31, %v6213_v62 }
 0x1b4   : > { %v2330_v20 = vmul.f32 %v6312_v1, %v2293_v51 }
 0x1b5   : > { %v6230_v41 = vpop.permute.xlu0 %2684 }
 0x1b6   : > { %v4855_v13 = vpack.i.bf16 %v2330_v20, %v2329_v10 }
 0x1b7   : > { %3536 = vrot.lane.b32.xlu1 %v4270_v0, %s5093_s13  ;;  %3534 = vrot.lane.b32.xlu0 %v4269_v22, %s5093_s13  ;;  %v2296_v0 = vsel %vm1771_vm8, %v6053_v16, %v6127_v44  ;;  %v4757_v22 = vpop.permute.xlu1 %4756  ;;  %v6342_v16 = vld [vmem:[%s5353_s24 + $0xa0] sm:$0xff]  ;;  %v6346_v44 = vld [vmem:[%s5353_s24 + $0xa8] sm:$0xff] }
 0x1b8   : > { %v4759_v25 = vunpack.i.h.bf16 %v4757_v22 }
 0x1b9   : > { %v6284_v38 = vpop.permute.xlu0 %2688 }
 0x1bb   : > { %3540 = vrot.lane.b32.xlu1 %v4272_v63, %s5093_s13  ;;  %3538 = vrot.lane.b32.xlu0 %v4271_v28, %s5093_s13  ;;  %v6323_v63 = vmul.f32 %v6062_v29, %v6297_v9  ;;  %v6326_v28 = vld [vmem:[%s5353_s24 + $0x68] sm:$0xff]  ;;  %v2334_v29 = vmul.f32 %v6342_v16, %v2295_v4 }
 0x1bc   : > { %v2328_v32 = vmul.f32 %v6326_v28, %v6085_v43  ;;  %v2335_v43 = vmul.f32 %v6346_v44, %v2296_v0 }
 0x1be   : > { %v4865_v51 = vpack.i.bf16 %v2335_v43, %v2334_v29  ;;  %v2710_v43 = vsel %vm1349_vm7, %v6230_v41, %v6262_v56 }
 0x1bf   : > { %3544 = vrot.lane.b32.xlu1 %v4274_v59, %s5093_s13  ;;  %3542 = vrot.lane.b32.xlu0 %v4273_v47, %s5093_s13  ;;  %v4758_v59 = vunpack.i.l.bf16 %v4757_v22  ;;  %v4762_v47 = vpop.permute.xlu0 %4761  ;;  %v2709_v22 = vsel %vm1349_vm7, %v6207_v6, %v6230_v41  ;;  %v4880_v41 = vpack.i.bf16 %v2740_v3, %v2739_v23 }
 0x1c0   : > { %v4764_v40 = vunpack.i.h.bf16 %v4762_v47  ;;  %v4763_v30 = vunpack.i.l.bf16 %v4762_v47  ;;  %v2744_v36 = vmul.f32 %v6255_v50, %v2709_v22 }
 0x1c1   : > { %v1359_v27 = vsel %vm1349_vm7, %v4758_v59, %v4759_v25 }
 0x1c3   : > { %4831 = vrot.lane.b32.xlu0 %v4830_v12, %s5096_s4  ;;  %4836 = vrot.lane.b32.xlu1 %v4835_v60, %s5096_s4  ;;  %v4875_v12 = vpack.i.bf16 %v2333_v21, %v2328_v32  ;;  %v4870_v60 = vpack.i.bf16 %v6323_v63, %v2336_v14  ;;  %v1360_v63 = vsel %vm1349_vm7, %v4759_v25, %v4763_v30 }
 0x1c4   : > { %v1361_v32 = vsel %vm1349_vm7, %v4763_v30, %v4764_v40  ;;  %v2738_v40 = vmul.f32 %v6287_v49, %v6172_v53  ;;  %v2743_v30 = vmul.f32 %v6292_v18, %v6207_v6  ;;  %v4124_v6 = vld [vmem:[%s6860_s1 + $0x48] sm:$0xff] }
 0x1c7   : > { %4841 = vrot.lane.b32.xlu0 %v4840_v57, %s5096_s4  ;;  %4846 = vrot.lane.b32.xlu1 %v4845_v33, %s5096_s4  ;;  %v2741_v57 = vmul.f32 %v6243_v35, %v2708_v8 }
 0x1c9   : > { %v4767_v26 = vpop.permute.xlu1 %4766  ;;  %v4885_v42 = vpack.i.bf16 %v2742_v54, %v2741_v57 }
 0x1ca   : > { %v4769_v52 = vunpack.i.h.bf16 %v4767_v26  ;;  %v4768_v37 = vunpack.i.l.bf16 %v4767_v26  ;;  %v2745_v26 = vmul.f32 %v6259_v55, %v2710_v43 }
 0x1cb   : > { %4851 = vrot.lane.b32.xlu0 %v4850_v39, %s5096_s4  ;;  %4856 = vrot.lane.b32.xlu1 %v4855_v13, %s5096_s4 }
 0x1cc   : > { %v1363_v7 = vsel %vm1349_vm7, %v4768_v37, %v4769_v52 }
 0x1cd   : > { %v4777_v33 = vpop.permute.xlu1 %4776  ;;  %v4772_v10 = vpop.permute.xlu0 %4771  ;;  %v4328_v48 = vpack.c.bf16 %v1363_v7, %v1359_v27 }
 0x1ce   : > { %v4779_v17 = vunpack.i.h.bf16 %v4777_v33  ;;  %v4778_v20 = vunpack.i.l.bf16 %v4777_v33  ;;  %v4774_v4 = vunpack.i.h.bf16 %v4772_v10  ;;  %v4773_v0 = vunpack.i.l.bf16 %v4772_v10 }
 0x1cf   : > { %4861 = vrot.lane.b32.xlu0 %v4860_v2, %s5096_s4  ;;  %4866 = vrot.lane.b32.xlu1 %v4865_v51, %s5096_s4 }
 0x1d0   : > { %v1358_v31 = vsel %vm1349_vm7, %v4778_v20, %v4758_v59  ;;  %v1362_v21 = vsel %vm1349_vm7, %v4779_v17, %v4768_v37  ;;  %v1364_v14 = vsel %vm1349_vm7, %v4769_v52, %v4773_v0  ;;  %4329 = vmatprep.subr.bf16.mxu0 %v4328_v48  ;;  %v1365_v29 = vsel %vm1349_vm7, %v4773_v0, %v4774_v4  ;;  %v4125_v0 = vld [vmem:[%s6860_s1 + $0x50] sm:$0xff] }
 0x1d1   : > { %v4330_v25 = vpack.c.bf16 %v1362_v21, %v1358_v31  ;;  %v4338_v47 = vpack.c.bf16 %v1364_v14, %v1360_v63  ;;  %v2693_v39 = vpop.permute.xlu1 %2692  ;;  %v6382_v2 = vpop.permute.xlu0 %2690  ;;  %v4336_v13 = vpack.c.bf16 %v1365_v29, %v1361_v32  ;;  %v2711_v59 = vsel %vm1349_vm7, %v6262_v56, %v6284_v38 }
 0x1d2   : > { %v2746_v8 = vmul.f32 %v6267_v19, %v2711_v59  ;;  %v2747_v52 = vmul.f32 %v6284_v38, %v6249_v61  ;;  %v4890_v38 = vpack.i.bf16 %v2745_v26, %v2744_v36  ;;  %v2712_v51 = vsel %vm1349_vm7, %v6382_v2, %v2693_v39 }
 0x1d3   : > { %4871 = vrot.lane.b32.xlu0 %v4870_v60, %s5096_s4  ;;  %4876 = vrot.lane.b32.xlu1 %v4875_v12, %s5096_s4  ;;  %v4123_v12 = vld [vmem:[%s6860_s1 + $0x40] sm:$0xff]  ;;  %v2749_v57 = vmul.f32 %v6304_v15, %v2712_v51  ;;  %v4900_v48 = vpack.i.bf16 %v2743_v30, %v2738_v40  ;;  %v2748_v59 = vmul.f32 %v6326_v28, %v6382_v2 }
 0x1d4   : > { %4331 = vmatpush1.bf16.msra.mxu0 %v4330_v25  ;;  %4337 = vmatprep.subr.bf16.mxu1 %v4336_v13  ;;  %v4895_v23 = vpack.i.bf16 %v2747_v52, %v2746_v8  ;;  %v4126_v13 = vld [vmem:[%s6860_s1 + $0x58] sm:$0xff] }
 0x1d5   : > { %4339 = vmatpush1.bf16.msra.mxu1 %v4338_v47  ;;  %v2697_v37 = vpop.permute.xlu1 %2696  ;;  %v2695_v56 = vpop.permute.xlu0 %2694 }
 0x1d6   : > { %v2713_v60 = vsel %vm1349_vm7, %v2693_v39, %v2695_v56  ;;  %v2714_v27 = vsel %vm1349_vm7, %v2695_v56, %v2697_v37  ;;  %v2752_v54 = vmul.f32 %v2697_v37, %v6273_v58 }
 0x1d7   : > { %4881 = vrot.lane.b32.xlu0 %v4880_v41, %s5092_s8  ;;  %4886 = vrot.lane.b32.xlu1 %v4885_v42, %s5092_s8  ;;  %v2750_v53 = vmul.f32 %v6312_v1, %v2713_v60  ;;  %v2751_v33 = vmul.f32 %v6025_v24, %v2714_v27 }
 0x1d8   : > { %4131 = vmatmul.mubr.msk.f32.vlgmr.msra.gmra.mrb[0].mxu1 %vm537_vm5, %v4123_v12  ;;  %4127 = vmatmul.mubr.msk.f32.vlgmr.msra.gmra.mrb[0].mxu0 %vm537_vm5, %v4123_v12 }
 0x1d9   : > { %v2701_v7 = vpop.permute.xlu1 %2700  ;;  %v2699_v3 = vpop.permute.xlu0 %2698  ;;  %1553 = vmatprep.mubr.f32.mxu1 %v5095_v34  ;;  %1464 = vmatprep.mubr.f32.mxu0 %v5095_v34  ;;  %v4905_v17 = vpack.i.bf16 %v2750_v53, %v2749_v57  ;;  %v4910_v21 = vpack.i.bf16 %v2752_v54, %v2751_v33 }
 0x1da   : > { %v2715_v10 = vsel %vm1349_vm7, %v2699_v3, %v2701_v7  ;;  %v2753_v14 = vmul.f32 %v6331_v45, %v2699_v3 }
 0x1db   : > { %4891 = vrot.lane.b32.xlu0 %v4890_v38, %s5092_s8  ;;  %4896 = vrot.lane.b32.xlu1 %v4895_v23, %s5092_s8  ;;  %v2754_v32 = vmul.f32 %v6342_v16, %v2715_v10 }
 0x1dc   : > { %4132 = vmatmul.mubr.msk.f32.gmra.mrb[2].mxu1 %vm537_vm5, %v4124_v6  ;;  %4128 = vmatmul.mubr.msk.f32.gmra.mrb[2].mxu0 %vm537_vm5, %v4124_v6  ;;  %v4925_v8 = vpack.i.bf16 %v2753_v14, %v2748_v59 }
 0x1dd   : > { %v2705_v20 = vpop.permute.xlu1 %2704  ;;  %v2703_v4 = vpop.permute.xlu0 %2702  ;;  %1559 = vmatprep.mubr.f32.mxu1 %v5095_v34  ;;  %1470 = vmatprep.mubr.f32.mxu0 %v5095_v34 }
 0x1de   : > { %v2717_v22 = vsel %vm1349_vm7, %v2703_v4, %v2705_v20  ;;  %v2716_v63 = vsel %vm1349_vm7, %v2701_v7, %v2703_v4  ;;  %v2757_v29 = vmul.f32 %v2705_v20, %v6297_v9 }
 0x1df   : > { %v2755_v31 = vmul.f32 %v6346_v44, %v2716_v63  ;;  %4901 = vrot.lane.b32.xlu0 %v4900_v48, %s5092_s8  ;;  %4906 = vrot.lane.b32.xlu1 %v4905_v17, %s5092_s8  ;;  %v2756_v43 = vmul.f32 %v6336_v5, %v2717_v22 }
 0x1e0   : > { %4133 = vmatmul.mubr.msk.f32.gmra.mrb[4].mxu1 %vm537_vm5, %v4125_v0  ;;  %4129 = vmatmul.mubr.msk.f32.gmra.mrb[4].mxu0 %vm537_vm5, %v4125_v0 }
 0x1e1   : > { %v4915_v25 = vpack.i.bf16 %v2755_v31, %v2754_v32  ;;  %v4787_v47 = vpop.permute.xlu1 %4786  ;;  %v4782_v39 = vpop.permute.xlu0 %4781  ;;  %1565 = vmatprep.mubr.f32.mxu1 %v5095_v34  ;;  %1476 = vmatprep.mubr.f32.mxu0 %v5095_v34  ;;  %v4920_v52 = vpack.i.bf16 %v2757_v29, %v2756_v43 }
 0x1e2   : > { %v4788_v36 = vunpack.i.l.bf16 %v4787_v47  ;;  %v4784_v26 = vunpack.i.h.bf16 %v4782_v39  ;;  %v4783_v41 = vunpack.i.l.bf16 %v4782_v39  ;;  %v4789_v42 = vunpack.i.h.bf16 %v4787_v47 }
 0x1e3   : > { %4911 = vrot.lane.b32.xlu0 %v4910_v21, %s5092_s8  ;;  %4916 = vrot.lane.b32.xlu1 %v4915_v25, %s5092_s8 }
 0x1e4   : > { %4134 = vmatmul.mubr.msk.f32.gmra.mrb[6].mxu1 %vm537_vm5, %v4126_v13  ;;  %4130 = vmatmul.mubr.msk.f32.gmra.mrb[6].mxu0 %vm537_vm5, %v4126_v13  ;;  %v1774_v30 = vsel %vm1771_vm8, %v4784_v26, %v4788_v36  ;;  %v1773_v38 = vsel %vm1771_vm8, %v4783_v41, %v4784_v26  ;;  %v1775_v27 = vsel %vm1771_vm8, %v4788_v36, %v4789_v42 }
 0x1e5   : > { %v4797_v37 = vpop.permute.xlu1 %4796  ;;  %v4792_v56 = vpop.permute.xlu0 %4791  ;;  %1969 = vmatprep.mubr.f32.mxu1 %v5095_v34  ;;  %1880 = vmatprep.mubr.f32.mxu0 %v5095_v34 }
 0x1e6   : > { %v4799_v2 = vunpack.i.h.bf16 %v4797_v37  ;;  %v4798_v12 = vunpack.i.l.bf16 %v4797_v37  ;;  %v4794_v60 = vunpack.i.h.bf16 %v4792_v56  ;;  %v4793_v40 = vunpack.i.l.bf16 %v4792_v56 }
 0x1e7   : > { %4921 = vrot.lane.b32.xlu0 %v4920_v52, %s5092_s8  ;;  %4926 = vrot.lane.b32.xlu1 %v4925_v8, %s5092_s8 }
 0x1e8   : > { %v1778_v51 = vsel %vm1771_vm8, %v4794_v60, %v4798_v12  ;;  %v1777_v23 = vsel %vm1771_vm8, %v4793_v40, %v4794_v60  ;;  %v1779_v53 = vsel %vm1771_vm8, %v4798_v12, %v4799_v2 }
 0x1e9   : > { %v4350_v7 = vpack.c.bf16 %v1778_v51, %v1774_v30  ;;  %v3095_v3 = vpop.permute.xlu1 %3094  ;;  %v4802_v6 = vpop.permute.xlu0 %4801  ;;  %v4340_v57 = vpack.c.bf16 %v1777_v23, %v1773_v38  ;;  %v4348_v54 = vpack.c.bf16 %v1779_v53, %v1775_v27 }
 0x1ea   : > { %v4804_v33 = vunpack.i.h.bf16 %v4802_v6  ;;  %v4803_v10 = vunpack.i.l.bf16 %v4802_v6  ;;  %v3158_v60 = vmul.f32 %v6287_v49, %v3095_v3 }
 0x1eb   : > { %4341 = vmatprep.subr.bf16.mxu0 %v4340_v57  ;;  %4349 = vmatprep.subr.bf16.mxu1 %v4348_v54 }
 0x1ec   : > { %v1772_v48 = vsel %vm1771_vm8, %v4803_v10, %v4783_v41  ;;  %v1776_v17 = vsel %vm1771_vm8, %v4804_v33, %v4793_v40  ;;  %4351 = vmatpush1.bf16.msra.mxu1 %v4350_v7 }
 0x1ed   : > { %v4342_v20 = vpack.c.bf16 %v1776_v17, %v1772_v48  ;;  %v3099_v4 = vpop.permute.xlu1 %3098  ;;  %v3097_v0 = vpop.permute.xlu0 %3096 }
 0x1ee   : > { %v3126_v22 = vsel %vm927_vm4, %v3095_v3, %v3097_v0  ;;  %v3127_v63 = vsel %vm927_vm4, %v3097_v0, %v3099_v4 }
 0x1ef   : > { %v3159_v32 = vmul.f32 %v6221_v11, %v3126_v22  ;;  %v3160_v31 = vmul.f32 %v6239_v46, %v3127_v63  ;;  %4343 = vmatpush1.bf16.msra.mxu0 %v4342_v20 }
 0x1f1   : > { %v4930_v21 = vpack.i.bf16 %v3160_v31, %v3159_v32  ;;  %v3103_v14 = vpop.permute.xlu1 %3102  ;;  %v3101_v29 = vpop.permute.xlu0 %3100  ;;  %v4356_v31 = vpack.c.bf16 %v6255_v50, %v6221_v11 }
 0x1f2   : > { %v3128_v43 = vsel %vm927_vm4, %v3099_v4, %v3101_v29  ;;  %v3162_v25 = vmul.f32 %v3101_v29, %v6213_v62  ;;  %v3163_v8 = vmul.f32 %v6292_v18, %v3103_v14 }
 0x1f3   : > { %v3161_v47 = vmul.f32 %v6243_v35, %v3128_v43  ;;  %4931 = vrot.lane.b32.xlu0 %v4930_v21, %s5091_s10 }
 0x1f4   : > { %v4950_v51 = vpack.i.bf16 %v3163_v8, %v3158_v60 }
 0x1f5   : > { %v4935_v39 = vpack.i.bf16 %v3162_v25, %v3161_v47  ;;  %v3107_v13 = vpop.permute.xlu1 %3106  ;;  %v3105_v59 = vpop.permute.xlu0 %3104 }
 0x1f6   : > { %v3129_v36 = vsel %vm927_vm4, %v3103_v14, %v3105_v59  ;;  %v3130_v26 = vsel %vm927_vm4, %v3105_v59, %v3107_v13 }
 0x1f7   : > { %v3164_v41 = vmul.f32 %v6255_v50, %v3129_v36  ;;  %v3165_v42 = vmul.f32 %v6259_v55, %v3130_v26  ;;  %4936 = vrot.lane.b32.xlu1 %v4935_v39, %s5091_s10  ;;  %v4364_v36 = vpack.c.bf16 %v6267_v19, %v6243_v35 }
 0x1f9   : > { %v4940_v52 = vpack.i.bf16 %v3165_v42, %v3164_v41  ;;  %v4807_v37 = vpop.permute.xlu1 %4806  ;;  %v3109_v56 = vpop.permute.xlu0 %3108  ;;  %v4151_v41 = vld [vmem:[%s6860_s1 + $0x60] sm:$0xff]  ;;  %v4366_v42 = vpack.c.bf16 %v6259_v55, %v6239_v46 }
 0x1fa   : > { %v3131_v2 = vsel %vm927_vm4, %v3107_v13, %v3109_v56  ;;  %v3167_v12 = vmul.f32 %v3109_v56, %v6249_v61  ;;  %v4809_v30 = vunpack.i.h.bf16 %v4807_v37  ;;  %v4808_v38 = vunpack.i.l.bf16 %v4807_v37 }
 0x1fb   : > { %v3166_v40 = vmul.f32 %v6267_v19, %v3131_v2  ;;  %4941 = vrot.lane.b32.xlu0 %v4940_v52, %s5091_s10  ;;  %v4358_v37 = vpack.c.bf16 %v6292_v18, %v6287_v49  ;;  %v4368_v56 = vpack.c.bf16 %v6336_v5, %v6025_v24 }
 0x1fc   : > { %v1781_v3 = vsel %vm1771_vm8, %v4808_v38, %v4809_v30 }
 0x1fd   : > { %v4945_v23 = vpack.i.bf16 %v3167_v12, %v3166_v40  ;;  %v4817_v27 = vpop.permute.xlu1 %4816  ;;  %v4812_v53 = vpop.permute.xlu0 %4811  ;;  %v4360_v40 = vpack.c.bf16 %v6342_v16, %v6304_v15 }
 0x1fe   : > { %v4819_v7 = vunpack.i.h.bf16 %v4817_v27  ;;  %v4818_v6 = vunpack.i.l.bf16 %v4817_v27  ;;  %v4814_v57 = vunpack.i.h.bf16 %v4812_v53  ;;  %v4813_v54 = vunpack.i.l.bf16 %v4812_v53 }
 0x1ff   : > { %4951 = vrot.lane.b32.xlu0 %v4950_v51, %s5091_s10  ;;  %4946 = vrot.lane.b32.xlu1 %v4945_v23, %s5091_s10 }
 0x200   : > { %v1785_v33 = vsel %vm1771_vm8, %v4818_v6, %v4819_v7  ;;  %v1782_v63 = vsel %vm1771_vm8, %v4809_v30, %v4813_v54  ;;  %v1783_v32 = vsel %vm1771_vm8, %v4813_v54, %v4814_v57  ;;  %v4362_v57 = vpack.c.bf16 %v6331_v45, %v6326_v28 }
 0x201   : > { %v4827_v10 = vpop.permute.xlu1 %4826  ;;  %v4822_v48 = vpop.permute.xlu0 %4821  ;;  %v4344_v17 = vpack.c.bf16 %v1785_v33, %v1781_v3 }
 0x202   : > { %v4829_v20 = vunpack.i.h.bf16 %v4827_v10  ;;  %v4828_v4 = vunpack.i.l.bf16 %v4827_v10  ;;  %v4824_v0 = vunpack.i.h.bf16 %v4822_v48  ;;  %v4823_v22 = vunpack.i.l.bf16 %v4822_v48  ;;  %v4153_v10 = vld [vmem:[%s6860_s1 + $0x70] sm:$0xff] }
 0x203   : > { %4345 = vmatprep.subr.bf16.mxu0 %v4344_v17 }
 0x204   : > { %v1780_v21 = vsel %vm1771_vm8, %v4828_v4, %v4808_v38  ;;  %v1784_v14 = vsel %vm1771_vm8, %v4829_v20, %v4818_v6  ;;  %v1786_v29 = vsel %vm1771_vm8, %v4819_v7, %v4823_v22  ;;  %v1787_v43 = vsel %vm1771_vm8, %v4823_v22, %v4824_v0  ;;  %v4152_v6 = vld [vmem:[%s6860_s1 + $0x68] sm:$0xff] }
 0x205   : > { %v4346_v25 = vpack.c.bf16 %v1784_v14, %v1780_v21  ;;  %v4354_v47 = vpack.c.bf16 %v1786_v29, %v1782_v63  ;;  %v3113_v39 = vpop.permute.xlu1 %3112  ;;  %v6493_v13 = vpop.permute.xlu0 %3110  ;;  %v4352_v59 = vpack.c.bf16 %v1787_v43, %v1783_v32  ;;  %v4154_v29 = vld [vmem:[%s6860_s1 + $0x78] sm:$0xff] }
 0x206   : > { %v3132_v26 = vsel %vm927_vm4, %v6493_v13, %v3113_v39  ;;  %v3168_v43 = vmul.f32 %v6326_v28, %v6493_v13 }
 0x207   : > { %4347 = vmatpush1.bf16.msra.mxu0 %v4346_v25  ;;  %4353 = vmatprep.subr.bf16.mxu1 %v4352_v59  ;;  %v3169_v30 = vmul.f32 %v6304_v15, %v3132_v26 }
 0x208   : > { %4355 = vmatpush1.bf16.msra.mxu1 %v4354_v47  ;;  %4357 = vmatprep.subr.bf16.mxu0 %v4356_v31 }
 0x209   : > { %v3117_v8 = vpop.permute.xlu1 %3116  ;;  %v3115_v52 = vpop.permute.xlu0 %3114  ;;  %4365 = vmatprep.subr.bf16.mxu1 %v4364_v36  ;;  %v4163_v36 = vld [vmem:[%s6860_s1 + $0x80] sm:$0xff] }
 0x20a   : > { %v3172_v2 = vmul.f32 %v3117_v8, %v6273_v58  ;;  %v3134_v12 = vsel %vm927_vm4, %v3115_v52, %v3117_v8  ;;  %v3133_v60 = vsel %vm927_vm4, %v3113_v39, %v3115_v52  ;;  %4155 = vmatmul.mubr.msk.f32.vlgmr.msra.gmra.mrb[0].mxu0 %vm537_vm5, %v4151_v41 }
 0x20b   : > { %v3171_v38 = vmul.f32 %v6025_v24, %v3134_v12  ;;  %v3170_v51 = vmul.f32 %v6312_v1, %v3133_v60  ;;  %4159 = vmatmul.mubr.msk.f32.vlgmr.msra.gmra.mrb[0].mxu1 %vm537_vm5, %v4151_v41  ;;  %1886 = vmatprep.mubr.f32.mxu0 %v5095_v34  ;;  %v4370_v24 = vpack.c.bf16 %v6346_v44, %v6312_v1  ;;  %v4165_v60 = vld [vmem:[%s6860_s1 + $0x90] sm:$0xff] }
 0x20c   : > { %1975 = vmatprep.mubr.f32.mxu1 %v5095_v34  ;;  %4367 = vmatpush1.bf16.msra.mxu1 %v4366_v42 }
 0x20d   : > { %v4960_v23 = vpack.i.bf16 %v3172_v2, %v3171_v38  ;;  %v4955_v27 = vpack.i.bf16 %v3170_v51, %v3169_v30  ;;  %v3121_v53 = vpop.permute.xlu1 %3120  ;;  %v3119_v7 = vpop.permute.xlu0 %3118  ;;  %4359 = vmatpush1.bf16.msra.mxu0 %v4358_v37  ;;  %4369 = vmatprep.subr.bf16.mxu1 %v4368_v56 }
 0x20e   : > { %4156 = vmatmul.mubr.msk.f32.gmra.mrb[2].mxu0 %vm537_vm5, %v4152_v6  ;;  %4361 = vmatprep.subr.bf16.mxu0 %v4360_v40  ;;  %v3135_v54 = vsel %vm927_vm4, %v3119_v7, %v3121_v53  ;;  %v3173_v63 = vmul.f32 %v6331_v45, %v3119_v7 }
 0x20f   : > { %4961 = vrot.lane.b32.xlu0 %v4960_v23, %s5091_s10  ;;  %4956 = vrot.lane.b32.xlu1 %v4955_v27, %s5091_s10  ;;  %v3174_v4 = vmul.f32 %v6342_v16, %v3135_v54 }
 0x210   : > { %4160 = vmatmul.mubr.msk.f32.gmra.mrb[2].mxu1 %vm537_vm5, %v4152_v6  ;;  %1892 = vmatprep.mubr.f32.mxu0 %v5095_v34  ;;  %v4975_v47 = vpack.i.bf16 %v3173_v63, %v3168_v43 }
 0x211   : > { %v3125_v3 = vpop.permute.xlu1 %3124  ;;  %v3123_v33 = vpop.permute.xlu0 %3122  ;;  %1981 = vmatprep.mubr.f32.mxu1 %v5095_v34  ;;  %4371 = vmatpush1.bf16.msra.mxu1 %v4370_v24 }
 0x212   : > { %v3177_v48 = vmul.f32 %v3125_v3, %v6297_v9  ;;  %v3137_v17 = vsel %vm927_vm4, %v3123_v33, %v3125_v3  ;;  %v3136_v20 = vsel %vm927_vm4, %v3121_v53, %v3123_v33  ;;  %4157 = vmatmul.mubr.msk.f32.gmra.mrb[4].mxu0 %vm537_vm5, %v4153_v10 }
 0x213   : > { %v3176_v0 = vmul.f32 %v6336_v5, %v3137_v17  ;;  %v3175_v22 = vmul.f32 %v6346_v44, %v3136_v20  ;;  %1898 = vmatprep.mubr.f32.mxu0 %v5095_v34  ;;  %4363 = vmatpush1.bf16.msra.mxu0 %v4362_v57 }
 0x214   : > { %4161 = vmatmul.mubr.msk.f32.gmra.mrb[4].mxu1 %vm537_vm5, %v4153_v10 }
 0x215   : > { %v4970_v32 = vpack.i.bf16 %v3177_v48, %v3176_v0  ;;  %v4965_v31 = vpack.i.bf16 %v3175_v22, %v3174_v4  ;;  %v3517_v21 = vpop.permute.xlu1 %3516  ;;  %v3515_v14 = vpop.permute.xlu0 %3514  ;;  %1987 = vmatprep.mubr.f32.mxu1 %v5095_v34  ;;  %v5048_v48 = vld [vmem:[%s5353_s24 + $0x80] sm:$0xff] }
 0x216   : > { %4158 = vmatmul.mubr.msk.f32.gmra.mrb[6].mxu0 %vm537_vm5, %v4154_v29  ;;  %v3546_v25 = vsel %vm504_vm3, %v3515_v14, %v3517_v21 }
 0x217   : > { %4971 = vrot.lane.b32.xlu0 %v4970_v32, %s5091_s10  ;;  %4966 = vrot.lane.b32.xlu1 %v4965_v31, %s5091_s10  ;;  %v3579_v42 = vmul.f32 %v6221_v11, %v3546_v25  ;;  %v4164_v11 = vld [vmem:[%s6860_s1 + $0x88] sm:$0xff] }
 0x218   : > { %4162 = vmatmul.mubr.msk.f32.gmra.mrb[6].mxu1 %vm537_vm5, %v4154_v29  ;;  %2091 = vmatprep.mubr.f32.mxu0 %v5095_v34 }
 0x219   : > { %v3521_v39 = vpop.permute.xlu1 %3520  ;;  %v3519_v59 = vpop.permute.xlu0 %3518  ;;  %2180 = vmatprep.mubr.f32.mxu1 %v5095_v34 }
 0x21a   : > { %v3582_v13 = vmul.f32 %v3521_v39, %v6213_v62  ;;  %v3548_v26 = vsel %vm504_vm3, %v3519_v59, %v3521_v39  ;;  %v3547_v41 = vsel %vm504_vm3, %v3517_v21, %v3519_v59  ;;  %4167 = vmatmul.mubr.msk.f32.vlgmr.msra.gmra.mrb[0].mxu0 %vm537_vm5, %v4163_v36 }
 0x21b   : > { %v3581_v8 = vmul.f32 %v6243_v35, %v3548_v26  ;;  %v3580_v52 = vmul.f32 %v6239_v46, %v3547_v41  ;;  %4976 = vrot.lane.b32.xlu1 %v4975_v47, %s5091_s10  ;;  %2097 = vmatprep.mubr.f32.mxu0 %v5095_v34 }
 0x21c   : > { %4171 = vmatmul.mubr.msk.f32.vlgmr.msra.gmra.mrb[0].mxu1 %vm537_vm5, %v4163_v36 }
 0x21d   : > { %v4985_v37 = vpack.i.bf16 %v3582_v13, %v3581_v8  ;;  %v4980_v62 = vpack.i.bf16 %v3580_v52, %v3579_v42  ;;  %v3525_v56 = vpop.permute.xlu1 %3524  ;;  %v3523_v2 = vpop.permute.xlu0 %3522  ;;  %2186 = vmatprep.mubr.f32.mxu1 %v5095_v34 }
 0x21e   : > { %4168 = vmatmul.mubr.msk.f32.gmra.mrb[2].mxu0 %vm537_vm5, %v4164_v11  ;;  %v3549_v46 = vsel %vm504_vm3, %v3523_v2, %v3525_v56  ;;  %v3583_v53 = vmul.f32 %v6292_v18, %v3523_v2 }
 0x21f   : > { %4986 = vrot.lane.b32.xlu1 %v4985_v37, %s5090_s20  ;;  %4981 = vrot.lane.b32.xlu0 %v4980_v62, %s5090_s20  ;;  %v3584_v51 = vmul.f32 %v6255_v50, %v3549_v46  ;;  %v4166_v50 = vld [vmem:[%s6860_s1 + $0x98] sm:$0xff] }
 0x220   : > { %4172 = vmatmul.mubr.msk.f32.gmra.mrb[2].mxu1 %vm537_vm5, %v4164_v11  ;;  %2103 = vmatprep.mubr.f32.mxu0 %v5095_v34 }
 0x221   : > { %v3529_v35 = vpop.permute.xlu1 %3528  ;;  %v3527_v12 = vpop.permute.xlu0 %3526  ;;  %2192 = vmatprep.mubr.f32.mxu1 %v5095_v34 }
 0x222   : > { %v3587_v40 = vmul.f32 %v3529_v35, %v6249_v61  ;;  %v3551_v30 = vsel %vm504_vm3, %v3527_v12, %v3529_v35  ;;  %v3550_v38 = vsel %vm504_vm3, %v3525_v56, %v3527_v12  ;;  %4169 = vmatmul.mubr.msk.f32.gmra.mrb[4].mxu0 %vm537_vm5, %v4165_v60 }
 0x223   : > { %v3586_v23 = vmul.f32 %v6267_v19, %v3551_v30  ;;  %v3585_v27 = vmul.f32 %v6259_v55, %v3550_v38  ;;  %2109 = vmatprep.mubr.f32.mxu0 %v5095_v34  ;;  %v3578_v55 = vmul.f32 %v6287_v49, %v3515_v14 }
 0x224   : > { %4173 = vmatmul.mubr.msk.f32.gmra.mrb[4].mxu1 %vm537_vm5, %v4165_v60 }
 0x225   : > { %v4995_v7 = vpack.i.bf16 %v3587_v40, %v3586_v23  ;;  %v4990_v61 = vpack.i.bf16 %v3585_v27, %v3584_v51  ;;  %v3533_v6 = vpop.permute.xlu1 %3532  ;;  %v3531_v24 = vpop.permute.xlu0 %3530  ;;  %2198 = vmatprep.mubr.f32.mxu1 %v5095_v34  ;;  %v5000_v18 = vpack.i.bf16 %v3583_v53, %v3578_v55 }
 0x226   : > { %4170 = vmatmul.mubr.msk.f32.gmra.mrb[6].mxu0 %vm537_vm5, %v4166_v50  ;;  %v3552_v19 = vsel %vm504_vm3, %v3531_v24, %v3533_v6  ;;  %v3588_v13 = vmul.f32 %v6326_v28, %v3531_v24 }
 0x227   : > { %4996 = vrot.lane.b32.xlu1 %v4995_v7, %s5090_s20  ;;  %4991 = vrot.lane.b32.xlu0 %v4990_v61, %s5090_s20  ;;  %v3589_v10 = vmul.f32 %v6304_v15, %v3552_v19 }
 0x228   : > { %4174 = vmatmul.mubr.msk.f32.gmra.mrb[6].mxu1 %vm537_vm5, %v4166_v50  ;;  %2511 = vmatprep.mubr.f32.mxu0 %v5095_v34 }
 0x229   : > { %v3537_v57 = vpop.permute.xlu1 %3536  ;;  %v3535_v54 = vpop.permute.xlu0 %3534  ;;  %2600 = vmatprep.mubr.f32.mxu1 %v5095_v34 }
 0x22a   : > { %v3592_v3 = vmul.f32 %v3537_v57, %v6273_v58  ;;  %v3554_v33 = vsel %vm504_vm3, %v3535_v54, %v3537_v57  ;;  %v3553_v49 = vsel %vm504_vm3, %v3533_v6, %v3535_v54 }
 0x22b   : > { %v3591_v17 = vmul.f32 %v5048_v48, %v3554_v33  ;;  %v3590_v20 = vmul.f32 %v6312_v1, %v3553_v49  ;;  %5001 = vrot.lane.b32.xlu0 %v5000_v18, %s5090_s20 }
 0x22d   : > { %v5010_v4 = vpack.i.bf16 %v3592_v3, %v3591_v17  ;;  %v5005_v0 = vpack.i.bf16 %v3590_v20, %v3589_v10  ;;  %v3541_v22 = vpop.permute.xlu1 %3540  ;;  %v3539_v63 = vpop.permute.xlu0 %3538 }
 0x22e   : > { %v3555_v58 = vsel %vm504_vm3, %v3539_v63, %v3541_v22  ;;  %v3593_v25 = vmul.f32 %v6331_v45, %v3539_v63 }
 0x22f   : > { %5011 = vrot.lane.b32.xlu0 %v5010_v4, %s5090_s20  ;;  %5006 = vrot.lane.b32.xlu1 %v5005_v0, %s5090_s20  ;;  %v3594_v14 = vmul.f32 %v6342_v16, %v3555_v58 }
 0x230   : > { %v5025_v42 = vpack.i.bf16 %v3593_v25, %v3588_v13 }
 0x231   : > { %v3545_v32 = vpop.permute.xlu1 %3544  ;;  %v3543_v31 = vpop.permute.xlu0 %3542 }
 0x232   : > { %v3597_v15 = vmul.f32 %v3545_v32, %v6297_v9  ;;  %v3557_v21 = vsel %vm504_vm3, %v3543_v31, %v3545_v32  ;;  %v3556_v1 = vsel %vm504_vm3, %v3541_v22, %v3543_v31 }
 0x233   : > { %v3596_v29 = vmul.f32 %v6336_v5, %v3557_v21  ;;  %v3595_v43 = vmul.f32 %v6346_v44, %v3556_v1 }
 0x235   : > { %v5020_v47 = vpack.i.bf16 %v3597_v15, %v3596_v29  ;;  %v5015_v39 = vpack.i.bf16 %v3595_v43, %v3594_v14  ;;  %v4837_v59 = vpop.permute.xlu1 %4836  ;;  %v4832_v36 = vpop.permute.xlu0 %4831 }
 0x236   : > { %v4838_v26 = vunpack.i.l.bf16 %v4837_v59  ;;  %v4834_v9 = vunpack.i.h.bf16 %v4832_v36  ;;  %v4833_v41 = vunpack.i.l.bf16 %v4832_v36  ;;  %v4839_v16 = vunpack.i.h.bf16 %v4837_v59 }
 0x237   : > { %5021 = vrot.lane.b32.xlu0 %v5020_v47, %s5090_s20  ;;  %5016 = vrot.lane.b32.xlu1 %v5015_v39, %s5090_s20  ;;  %v4191_v39 = vld [vmem:[%s6860_s1 + $0xa0] sm:$0xff] }
 0x238   : > { %v2405_v62 = vsel %vm1653_vm6, %v4834_v9, %v4838_v26  ;;  %v2404_v28 = vsel %vm1653_vm6, %v4833_v41, %v4834_v9  ;;  %v2406_v11 = vsel %vm1653_vm6, %v4838_v26, %v4839_v16 }
 0x239   : > { %v4847_v5 = vpop.permute.xlu1 %4846  ;;  %v4842_v8 = vpop.permute.xlu0 %4841 }
 0x23a   : > { %v4849_v44 = vunpack.i.h.bf16 %v4847_v5  ;;  %v4848_v52 = vunpack.i.l.bf16 %v4847_v5  ;;  %v4844_v45 = vunpack.i.h.bf16 %v4842_v8  ;;  %v4843_v37 = vunpack.i.l.bf16 %v4842_v8  ;;  %v4192_v5 = vld [vmem:[%s6860_s1 + $0xa8] sm:$0xff] }
 0x23b   : > { %5026 = vrot.lane.b32.xlu1 %v5025_v42, %s5090_s20 }
 0x23c   : > { %v2409_v56 = vsel %vm1653_vm6, %v4844_v45, %v4848_v52  ;;  %v2408_v2 = vsel %vm1653_vm6, %v4843_v37, %v4844_v45  ;;  %v2410_v46 = vsel %vm1653_vm6, %v4848_v52, %v4849_v44 }
 0x23d   : > { %v4382_v35 = vpack.c.bf16 %v2409_v56, %v2405_v62  ;;  %v4857_v12 = vpop.permute.xlu1 %4856  ;;  %v4852_v60 = vpop.permute.xlu0 %4851  ;;  %v4372_v40 = vpack.c.bf16 %v2408_v2, %v2404_v28  ;;  %v4380_v30 = vpack.c.bf16 %v2410_v46, %v2406_v11 }
 0x23e   : > { %v4854_v38 = vunpack.i.h.bf16 %v4852_v60  ;;  %v4853_v51 = vunpack.i.l.bf16 %v4852_v60  ;;  %v4859_v23 = vunpack.i.h.bf16 %v4857_v12  ;;  %v4858_v27 = vunpack.i.l.bf16 %v4857_v12 }
 0x23f   : > { %4373 = vmatprep.subr.bf16.mxu0 %v4372_v40  ;;  %4381 = vmatprep.subr.bf16.mxu1 %v4380_v30 }
 0x240   : > { %v2403_v53 = vsel %vm1653_vm6, %v4853_v51, %v4833_v41  ;;  %v2407_v7 = vsel %vm1653_vm6, %v4854_v38, %v4843_v37  ;;  %4383 = vmatpush1.bf16.msra.mxu1 %v4382_v35  ;;  %v2412_v57 = vsel %vm1653_vm6, %v4858_v27, %v4859_v23  ;;  %v4193_v35 = vld [vmem:[%s6860_s1 + $0xb0] sm:$0xff] }
 0x241   : > { %v4374_v61 = vpack.c.bf16 %v2407_v7, %v2403_v53  ;;  %v4867_v6 = vpop.permute.xlu1 %4866  ;;  %v4862_v24 = vpop.permute.xlu0 %4861 }
 0x242   : > { %v4869_v50 = vunpack.i.h.bf16 %v4867_v6  ;;  %v4868_v55 = vunpack.i.l.bf16 %v4867_v6  ;;  %v4864_v19 = vunpack.i.h.bf16 %v4862_v24  ;;  %v4863_v18 = vunpack.i.l.bf16 %v4862_v24  ;;  %v4194_v6 = vld [vmem:[%s6860_s1 + $0xb8] sm:$0xff] }
 0x243   : > { %4375 = vmatpush1.bf16.msra.mxu0 %v4374_v61 }
 0x244   : > { %v2416_v54 = vsel %vm1653_vm6, %v4868_v55, %v4869_v50  ;;  %v2413_v4 = vsel %vm1653_vm6, %v4859_v23, %v4863_v18  ;;  %v2414_v0 = vsel %vm1653_vm6, %v4863_v18, %v4864_v19 }
 0x245   : > { %v4877_v3 = vpop.permute.xlu1 %4876  ;;  %v4872_v33 = vpop.permute.xlu0 %4871  ;;  %v4376_v49 = vpack.c.bf16 %v2416_v54, %v2412_v57 }
 0x246   : > { %v4879_v10 = vunpack.i.h.bf16 %v4877_v3  ;;  %v4878_v48 = vunpack.i.l.bf16 %v4877_v3  ;;  %v4874_v17 = vunpack.i.h.bf16 %v4872_v33  ;;  %v4873_v20 = vunpack.i.l.bf16 %v4872_v33 }
 0x247   : > { %4377 = vmatprep.subr.bf16.mxu0 %v4376_v49 }
 0x248   : > { %v2411_v22 = vsel %vm1653_vm6, %v4878_v48, %v4858_v27  ;;  %v2415_v63 = vsel %vm1653_vm6, %v4879_v10, %v4868_v55  ;;  %v2417_v58 = vsel %vm1653_vm6, %v4869_v50, %v4873_v20  ;;  %v2418_v32 = vsel %vm1653_vm6, %v4873_v20, %v4874_v17 }
 0x249   : > { %v4378_v31 = vpack.c.bf16 %v2415_v63, %v2411_v22  ;;  %v4386_v15 = vpack.c.bf16 %v2417_v58, %v2413_v4  ;;  %v4887_v21 = vpop.permute.xlu1 %4886  ;;  %v4882_v1 = vpop.permute.xlu0 %4881  ;;  %v4384_v14 = vpack.c.bf16 %v2418_v32, %v2414_v0  ;;  %v4219_v58 = vld [vmem:[%s6860_s1 + $0xc0] sm:$0xff]  ;;  %v4220_v32 = vld [vmem:[%s6860_s1 + $0xc8] sm:$0xff] }
 0x24a   : > { %v4888_v29 = vunpack.i.l.bf16 %v4887_v21  ;;  %v4884_v43 = vunpack.i.h.bf16 %v4882_v1  ;;  %v4883_v25 = vunpack.i.l.bf16 %v4882_v1  ;;  %v4889_v47 = vunpack.i.h.bf16 %v4887_v21 }
 0x24b   : > { %4379 = vmatpush1.bf16.msra.mxu0 %v4378_v31  ;;  %4385 = vmatprep.subr.bf16.mxu1 %v4384_v14  ;;  %v4221_v31 = vld [vmem:[%s6860_s1 + $0xd0] sm:$0xff] }
 0x24c   : > { %4387 = vmatpush1.bf16.msra.mxu1 %v4386_v15  ;;  %v2825_v16 = vsel %vm1231_vm2, %v4884_v43, %v4888_v29  ;;  %v2824_v42 = vsel %vm1231_vm2, %v4883_v25, %v4884_v43  ;;  %v2826_v52 = vsel %vm1231_vm2, %v4888_v29, %v4889_v47  ;;  %v4222_v29 = vld [vmem:[%s6860_s1 + $0xd8] sm:$0xff] }
 0x24d   : > { %v4897_v59 = vpop.permute.xlu1 %4896  ;;  %v4892_v36 = vpop.permute.xlu0 %4891 }
 0x24e   : > { %v4899_v13 = vunpack.i.h.bf16 %v4897_v59  ;;  %v4898_v26 = vunpack.i.l.bf16 %v4897_v59  ;;  %v4894_v9 = vunpack.i.h.bf16 %v4892_v36  ;;  %v4893_v41 = vunpack.i.l.bf16 %v4892_v36  ;;  %4195 = vmatmul.mubr.msk.f32.vlgmr.msra.gmra.mrb[0].mxu0 %vm537_vm5, %v4191_v39 }
 0x24f   : > { %4199 = vmatmul.mubr.msk.f32.vlgmr.msra.gmra.mrb[0].mxu1 %vm537_vm5, %v4191_v39  ;;  %2517 = vmatprep.mubr.f32.mxu0 %v5095_v34 }
 0x250   : > { %v2829_v8 = vsel %vm1231_vm2, %v4894_v9, %v4898_v26  ;;  %v2828_v44 = vsel %vm1231_vm2, %v4893_v41, %v4894_v9  ;;  %v2830_v45 = vsel %vm1231_vm2, %v4898_v26, %v4899_v13  ;;  %2606 = vmatprep.mubr.f32.mxu1 %v5095_v34 }
 0x251   : > { %v4398_v37 = vpack.c.bf16 %v2829_v8, %v2825_v16  ;;  %v4907_v62 = vpop.permute.xlu1 %4906  ;;  %v4902_v28 = vpop.permute.xlu0 %4901  ;;  %v4388_v56 = vpack.c.bf16 %v2828_v44, %v2824_v42  ;;  %v4396_v2 = vpack.c.bf16 %v2830_v45, %v2826_v52 }
 0x252   : > { %v4904_v11 = vunpack.i.h.bf16 %v4902_v28  ;;  %v4903_v46 = vunpack.i.l.bf16 %v4902_v28  ;;  %4196 = vmatmul.mubr.msk.f32.gmra.mrb[2].mxu0 %vm537_vm5, %v4192_v5  ;;  %v4909_v12 = vunpack.i.h.bf16 %v4907_v62  ;;  %v4908_v60 = vunpack.i.l.bf16 %v4907_v62 }
 0x253   : > { %4389 = vmatprep.subr.bf16.mxu0 %v4388_v56  ;;  %4397 = vmatprep.subr.bf16.mxu1 %v4396_v2 }
 0x254   : > { %v2823_v40 = vsel %vm1231_vm2, %v4903_v46, %v4883_v25  ;;  %v2827_v30 = vsel %vm1231_vm2, %v4904_v11, %v4893_v41  ;;  %4399 = vmatpush1.bf16.msra.mxu1 %v4398_v37  ;;  %2523 = vmatprep.mubr.f32.mxu0 %v5095_v34  ;;  %v2832_v24 = vsel %vm1231_vm2, %v4908_v60, %v4909_v12 }
 0x255   : > { %v4390_v38 = vpack.c.bf16 %v2827_v30, %v2823_v40  ;;  %v4917_v51 = vpop.permute.xlu1 %4916  ;;  %v4912_v23 = vpop.permute.xlu0 %4911  ;;  %4200 = vmatmul.mubr.msk.f32.gmra.mrb[2].mxu1 %vm537_vm5, %v4192_v5 }
 0x256   : > { %v4919_v27 = vunpack.i.h.bf16 %v4917_v51  ;;  %v4918_v53 = vunpack.i.l.bf16 %v4917_v51  ;;  %4197 = vmatmul.mubr.msk.f32.gmra.mrb[4].mxu0 %vm537_vm5, %v4193_v35  ;;  %2612 = vmatprep.mubr.f32.mxu1 %v5095_v34  ;;  %v4914_v7 = vunpack.i.h.bf16 %v4912_v23  ;;  %v4913_v61 = vunpack.i.l.bf16 %v4912_v23 }
 0x257   : > { %4391 = vmatpush1.bf16.msra.mxu0 %v4390_v38  ;;  %2529 = vmatprep.mubr.f32.mxu0 %v5095_v34 }
 0x258   : > { %v2836_v50 = vsel %vm1231_vm2, %v4918_v53, %v4919_v27  ;;  %v2833_v49 = vsel %vm1231_vm2, %v4909_v12, %v4913_v61  ;;  %v2834_v10 = vsel %vm1231_vm2, %v4913_v61, %v4914_v7 }
 0x259   : > { %v4927_v55 = vpop.permute.xlu1 %4926  ;;  %v4922_v19 = vpop.permute.xlu0 %4921  ;;  %v4392_v18 = vpack.c.bf16 %v2836_v50, %v2832_v24  ;;  %4201 = vmatmul.mubr.msk.f32.gmra.mrb[4].mxu1 %vm537_vm5, %v4193_v35 }
 0x25a   : > { %v4929_v57 = vunpack.i.h.bf16 %v4927_v55  ;;  %v4928_v54 = vunpack.i.l.bf16 %v4927_v55  ;;  %v4924_v3 = vunpack.i.h.bf16 %v4922_v19  ;;  %v4923_v33 = vunpack.i.l.bf16 %v4922_v19  ;;  %4198 = vmatmul.mubr.msk.f32.gmra.mrb[6].mxu0 %vm537_vm5, %v4194_v6  ;;  %2618 = vmatprep.mubr.f32.mxu1 %v5095_v34 }
 0x25b   : > { %4393 = vmatprep.subr.bf16.mxu0 %v4392_v18  ;;  %2931 = vmatprep.mubr.f32.mxu0 %v5095_v34 }
 0x25c   : > { %v2831_v48 = vsel %vm1231_vm2, %v4928_v54, %v4908_v60  ;;  %v2835_v17 = vsel %vm1231_vm2, %v4929_v57, %v4918_v53  ;;  %v2837_v20 = vsel %vm1231_vm2, %v4919_v27, %v4923_v33  ;;  %v2838_v4 = vsel %vm1231_vm2, %v4923_v33, %v4924_v3 }
 0x25d   : > { %v4394_v0 = vpack.c.bf16 %v2835_v17, %v2831_v48  ;;  %v4402_v22 = vpack.c.bf16 %v2837_v20, %v2833_v49  ;;  %v4400_v63 = vpack.c.bf16 %v2838_v4, %v2834_v10  ;;  %4202 = vmatmul.mubr.msk.f32.gmra.mrb[6].mxu1 %vm537_vm5, %v4194_v6  ;;  %v4247_v17 = vld [vmem:[%s6860_s1 + $0xe0] sm:$0xff] }
 0x25e   : > { %3020 = vmatprep.mubr.f32.mxu1 %v5095_v34 }
 0x25f   : > { %4395 = vmatpush1.bf16.msra.mxu0 %v4394_v0  ;;  %4401 = vmatprep.subr.bf16.mxu1 %v4400_v63 }
 0x260   : > { %4403 = vmatpush1.bf16.msra.mxu1 %v4402_v22  ;;  %v4248_v22 = vld [vmem:[%s6860_s1 + $0xe8] sm:$0xff] }
 0x262   : > { %4223 = vmatmul.mubr.msk.f32.vlgmr.msra.gmra.mrb[0].mxu0 %vm537_vm5, %v4219_v58 }
 0x263   : > { %4227 = vmatmul.mubr.msk.f32.vlgmr.msra.gmra.mrb[0].mxu1 %vm537_vm5, %v4219_v58  ;;  %2937 = vmatprep.mubr.f32.mxu0 %v5095_v34 }
 0x264   : > { %3026 = vmatprep.mubr.f32.mxu1 %v5095_v34 }
 0x265   : > { %v4932_v15 = vpop.permute.xlu0 %4931 }
 0x266   : > { %4224 = vmatmul.mubr.msk.f32.gmra.mrb[2].mxu0 %vm537_vm5, %v4220_v32  ;;  %v4934_v21 = vunpack.i.h.bf16 %v4932_v15  ;;  %v4933_v1 = vunpack.i.l.bf16 %v4932_v15  ;;  %v4249_v15 = vld [vmem:[%s6860_s1 + $0xf0] sm:$0xff] }
 0x267   : > { %4228 = vmatmul.mubr.msk.f32.gmra.mrb[2].mxu1 %vm537_vm5, %v4220_v32  ;;  %2943 = vmatprep.mubr.f32.mxu0 %v5095_v34 }
 0x268   : > { %3032 = vmatprep.mubr.f32.mxu1 %v5095_v34  ;;  %v3244_v36 = vsel %vm809_vm1, %v4933_v1, %v4934_v21 }
 0x269   : > { %v4937_v14 = vpop.permute.xlu1 %4936 }
 0x26a   : > { %4225 = vmatmul.mubr.msk.f32.gmra.mrb[4].mxu0 %vm537_vm5, %v4221_v31  ;;  %v4939_v39 = vunpack.i.h.bf16 %v4937_v14  ;;  %v4938_v59 = vunpack.i.l.bf16 %v4937_v14 }
 0x26b   : > { %4229 = vmatmul.mubr.msk.f32.gmra.mrb[4].mxu1 %vm537_vm5, %v4221_v31  ;;  %2949 = vmatprep.mubr.f32.mxu0 %v5095_v34 }
 0x26c   : > { %3038 = vmatprep.mubr.f32.mxu1 %v5095_v34  ;;  %v3245_v44 = vsel %vm809_vm1, %v4934_v21, %v4938_v59  ;;  %v3246_v52 = vsel %vm809_vm1, %v4938_v59, %v4939_v39 }
 0x26d   : > { %v4942_v43 = vpop.permute.xlu0 %4941 }
 0x26e   : > { %v4944_v25 = vunpack.i.h.bf16 %v4942_v43  ;;  %v4943_v47 = vunpack.i.l.bf16 %v4942_v43  ;;  %4226 = vmatmul.mubr.msk.f32.gmra.mrb[6].mxu0 %vm537_vm5, %v4222_v29 }
 0x26f   : > { %4230 = vmatmul.mubr.msk.f32.gmra.mrb[6].mxu1 %vm537_vm5, %v4222_v29  ;;  %3351 = vmatprep.mubr.f32.mxu0 %v5095_v34 }
 0x270   : > { %v3248_v13 = vsel %vm809_vm1, %v4943_v47, %v4944_v25  ;;  %3440 = vmatprep.mubr.f32.mxu1 %v5095_v34 }
 0x271   : > { %v4947_v26 = vpop.permute.xlu1 %4946  ;;  %v4952_v9 = vpop.permute.xlu0 %4951  ;;  %v4404_v41 = vpack.c.bf16 %v3248_v13, %v3244_v36 }
 0x272   : > { %v4949_v16 = vunpack.i.h.bf16 %v4947_v26  ;;  %v4948_v42 = vunpack.i.l.bf16 %v4947_v26  ;;  %v4954_v5 = vunpack.i.h.bf16 %v4952_v9  ;;  %v4953_v8 = vunpack.i.l.bf16 %v4952_v9 }
 0x273   : > { %4405 = vmatprep.subr.bf16.mxu0 %v4404_v41 }
 0x274   : > { %v3249_v45 = vsel %vm809_vm1, %v4944_v25, %v4948_v42  ;;  %v3243_v37 = vsel %vm809_vm1, %v4953_v8, %v4933_v1  ;;  %v3247_v62 = vsel %vm809_vm1, %v4954_v5, %v4943_v47  ;;  %v3250_v28 = vsel %vm809_vm1, %v4948_v42, %v4949_v16 }
 0x275   : > { %v4414_v56 = vpack.c.bf16 %v3249_v45, %v3245_v44  ;;  %v4406_v2 = vpack.c.bf16 %v3247_v62, %v3243_v37  ;;  %v4412_v11 = vpack.c.bf16 %v3250_v28, %v3246_v52  ;;  %v4250_v44 = vld [vmem:[%s6860_s1 + $0xf8] sm:$0xff] }
 0x277   : > { %4407 = vmatpush1.bf16.msra.mxu0 %v4406_v2  ;;  %4413 = vmatprep.subr.bf16.mxu1 %v4412_v11 }
 0x278   : > { %4415 = vmatpush1.bf16.msra.mxu1 %v4414_v56 }
 0x281   : > { %v4957_v46 = vpop.permute.xlu1 %4956  ;;  %v4962_v35 = vpop.permute.xlu0 %4961 }
 0x282   : > { %v4959_v12 = vunpack.i.h.bf16 %v4957_v46  ;;  %v4958_v60 = vunpack.i.l.bf16 %v4957_v46  ;;  %v4963_v40 = vunpack.i.l.bf16 %v4962_v35  ;;  %v4964_v30 = vunpack.i.h.bf16 %v4962_v35 }
 0x284   : > { %v3253_v61 = vsel %vm809_vm1, %v4959_v12, %v4963_v40  ;;  %v3252_v6 = vsel %vm809_vm1, %v4958_v60, %v4959_v12  ;;  %v3254_v55 = vsel %vm809_vm1, %v4963_v40, %v4964_v30 }
 0x289   : > { %v4967_v38 = vpop.permute.xlu1 %4966  ;;  %v4972_v51 = vpop.permute.xlu0 %4971 }
 0x28a   : > { %v4969_v23 = vunpack.i.h.bf16 %v4967_v38  ;;  %v4968_v27 = vunpack.i.l.bf16 %v4967_v38  ;;  %v4974_v53 = vunpack.i.h.bf16 %v4972_v51  ;;  %v4973_v7 = vunpack.i.l.bf16 %v4972_v51 }
 0x28c   : > { %v3257_v24 = vsel %vm809_vm1, %v4969_v23, %v4973_v7  ;;  %v3256_v50 = vsel %vm809_vm1, %v4968_v27, %v4969_v23  ;;  %v3258_v19 = vsel %vm809_vm1, %v4973_v7, %v4974_v53 }
 0x28d   : > { %v4418_v18 = vpack.c.bf16 %v3257_v24, %v3253_v61  ;;  %v4977_v57 = vpop.permute.xlu1 %4976  ;;  %v4408_v54 = vpack.c.bf16 %v3256_v50, %v3252_v6  ;;  %v4416_v3 = vpack.c.bf16 %v3258_v19, %v3254_v55 }
 0x28e   : > { %v4979_v33 = vunpack.i.h.bf16 %v4977_v57  ;;  %v4978_v49 = vunpack.i.l.bf16 %v4977_v57 }
 0x28f   : > { %4409 = vmatprep.subr.bf16.mxu0 %v4408_v54  ;;  %4417 = vmatprep.subr.bf16.mxu1 %v4416_v3  ;;  %v4275_v3 = vld [vmem:[%s6860_s1 + $0x100] sm:$0xff] }
 0x290   : > { %v3251_v10 = vsel %vm809_vm1, %v4978_v49, %v4958_v60  ;;  %v3255_v48 = vsel %vm809_vm1, %v4979_v33, %v4968_v27  ;;  %4419 = vmatpush1.bf16.msra.mxu1 %v4418_v18  ;;  %v4276_v49 = vld [vmem:[%s6860_s1 + $0x108] sm:$0xff] }
 0x291   : > { %v4410_v20 = vpack.c.bf16 %v3255_v48, %v3251_v10  ;;  %v4987_v4 = vpop.permute.xlu1 %4986  ;;  %v4982_v0 = vpop.permute.xlu0 %4981  ;;  %v4277_v10 = vld [vmem:[%s6860_s1 + $0x110] sm:$0xff]  ;;  %v4278_v48 = vld [vmem:[%s6860_s1 + $0x118] sm:$0xff] }
 0x292   : > { %v4988_v63 = vunpack.i.l.bf16 %v4987_v4  ;;  %v4984_v58 = vunpack.i.h.bf16 %v4982_v0  ;;  %v4983_v32 = vunpack.i.l.bf16 %v4982_v0  ;;  %v4989_v31 = vunpack.i.h.bf16 %v4987_v4  ;;  %v299_v4 = vld [vmem:[%s5161_s29] sm:$0xff] }
 0x293   : > { %4411 = vmatpush1.bf16.msra.mxu0 %v4410_v20  ;;  %4255 = vmatmul.mubr.msk.f32.vlgmr.msra.gmra.mrb[0].mxu1 %vm537_vm5, %v4247_v17 }
 0x294   : > { %3446 = vmatprep.mubr.f32.mxu1 %v5095_v34  ;;  %v3665_v47 = vsel %vm387_vm0, %v4984_v58, %v4988_v63  ;;  %v3664_v39 = vsel %vm387_vm0, %v4983_v32, %v4984_v58  ;;  %v3666_v13 = vsel %vm387_vm0, %v4988_v63, %v4989_v31  ;;  %v307_v58 = vunpack.c.l.bf16 %v299_v4 }
 0x296   : > { %4251 = vmatmul.mubr.msk.f32.vlgmr.msra.gmra.mrb[0].mxu0 %vm537_vm5, %v4247_v17  ;;  %v300_v17 = vld [vmem:[%s5161_s29 + $0x8] sm:$0xff] }
 0x297   : > { %4256 = vmatmul.mubr.msk.f32.gmra.mrb[2].mxu1 %vm537_vm5, %v4248_v22  ;;  %3357 = vmatprep.mubr.f32.mxu0 %v5095_v34  ;;  %v309_v20 = vunpack.c.l.bf16 %v300_v17  ;;  %v310_v0 = vunpack.c.h.bf16 %v300_v17 }
 0x298   : > { %3452 = vmatprep.mubr.f32.mxu1 %v5095_v34 }
 0x299   : > { %v4997_v21 = vpop.permute.xlu1 %4996  ;;  %v4992_v1 = vpop.permute.xlu0 %4991 }
 0x29a   : > { %v4999_v14 = vunpack.i.h.bf16 %v4997_v21  ;;  %v4998_v29 = vunpack.i.l.bf16 %v4997_v21  ;;  %v4994_v43 = vunpack.i.h.bf16 %v4992_v1  ;;  %v4993_v25 = vunpack.i.l.bf16 %v4992_v1  ;;  %4252 = vmatmul.mubr.msk.f32.gmra.mrb[2].mxu0 %vm537_vm5, %v4248_v22  ;;  %v302_v22 = vld [vmem:[%s5161_s29 + $0x18] sm:$0xff]  ;;  %v301_v1 = vld [vmem:[%s5161_s29 + $0x10] sm:$0xff] }
 0x29b   : > { %4257 = vmatmul.mubr.msk.f32.gmra.mrb[4].mxu1 %vm537_vm5, %v4249_v15  ;;  %3363 = vmatprep.mubr.f32.mxu0 %v5095_v34  ;;  %v313_v21 = vunpack.c.l.bf16 %v302_v22 }
 0x29c   : > { %v3669_v59 = vsel %vm387_vm0, %v4994_v43, %v4998_v29  ;;  %v3668_v36 = vsel %vm387_vm0, %v4993_v25, %v4994_v43  ;;  %v3670_v26 = vsel %vm387_vm0, %v4998_v29, %v4999_v14  ;;  %3458 = vmatprep.mubr.f32.mxu1 %v5095_v34  ;;  %v314_v29 = vunpack.c.h.bf16 %v302_v22 }
 0x29d   : > { %v4430_v9 = vpack.c.bf16 %v3669_v59, %v3665_v47  ;;  %v5002_v41 = vpop.permute.xlu0 %5001  ;;  %v4420_v16 = vpack.c.bf16 %v3668_v36, %v3664_v39  ;;  %v4428_v42 = vpack.c.bf16 %v3670_v26, %v3666_v13  ;;  %v311_v13 = vunpack.c.l.bf16 %v301_v1 }
 0x29e   : > { %v5004_v5 = vunpack.i.h.bf16 %v5002_v41  ;;  %v5003_v8 = vunpack.i.l.bf16 %v5002_v41  ;;  %4253 = vmatmul.mubr.msk.f32.gmra.mrb[4].mxu0 %vm537_vm5, %v4249_v15  ;;  %v308_v15 = vunpack.c.h.bf16 %v299_v4 }
 0x29f   : > { %4421 = vmatprep.subr.bf16.mxu0 %v4420_v16  ;;  %4429 = vmatprep.subr.bf16.mxu1 %v4428_v42  ;;  %v312_v16 = vunpack.c.h.bf16 %v301_v1 }
 0x2a0   : > { %v3663_v52 = vsel %vm387_vm0, %v5003_v8, %v4983_v32  ;;  %v3667_v45 = vsel %vm387_vm0, %v5004_v5, %v4993_v25  ;;  %4431 = vmatpush1.bf16.msra.mxu1 %v4430_v9  ;;  %3369 = vmatprep.mubr.f32.mxu0 %v5095_v34  ;;  %v303_v5 = vld [vmem:[%s5161_s29 + $0x20] sm:$0xff] }
 0x2a1   : > { %v4422_v37 = vpack.c.bf16 %v3667_v45, %v3663_v52  ;;  %4258 = vmatmul.mubr.msk.f32.gmra.mrb[6].mxu1 %vm537_vm5, %v4250_v44  ;;  %v5007_v62 = vpop.permute.xlu1 %5006  ;;  %v5012_v28 = vpop.permute.xlu0 %5011  ;;  %v306_v45 = vld [vmem:[%s5161_s29 + $0x38] sm:$0xff] }
 0x2a2   : > { %4254 = vmatmul.mubr.msk.f32.gmra.mrb[6].mxu0 %vm537_vm5, %v4250_v44  ;;  %3860 = vmatprep.mubr.f32.mxu1 %v5095_v34  ;;  %v5009_v56 = vunpack.i.h.bf16 %v5007_v62  ;;  %v5008_v2 = vunpack.i.l.bf16 %v5007_v62  ;;  %v5013_v11 = vunpack.i.l.bf16 %v5012_v28  ;;  %v5014_v46 = vunpack.i.h.bf16 %v5012_v28 }
 0x2a3   : > { %4423 = vmatpush1.bf16.msra.mxu0 %v4422_v37  ;;  %3771 = vmatprep.mubr.f32.mxu0 %v5095_v34 }
 0x2a4   : > { %v3673_v51 = vsel %vm387_vm0, %v5009_v56, %v5013_v11  ;;  %v3672_v23 = vsel %vm387_vm0, %v5008_v2, %v5009_v56  ;;  %v3674_v7 = vsel %vm387_vm0, %v5013_v11, %v5014_v46 }
 0x2a9   : > { %v5017_v35 = vpop.permute.xlu1 %5016  ;;  %v5022_v12 = vpop.permute.xlu0 %5021 }
 0x2aa   : > { %v5019_v60 = vunpack.i.h.bf16 %v5017_v35  ;;  %v5018_v40 = vunpack.i.l.bf16 %v5017_v35  ;;  %v5024_v30 = vunpack.i.h.bf16 %v5022_v12  ;;  %v5023_v38 = vunpack.i.l.bf16 %v5022_v12 }
 0x2ab   : > { %v315_v35 = vunpack.c.l.bf16 %v303_v5 }
 0x2ac   : > { %v3677_v27 = vsel %vm387_vm0, %v5019_v60, %v5023_v38  ;;  %v3676_v53 = vsel %vm387_vm0, %v5018_v40, %v5019_v60  ;;  %v3678_v61 = vsel %vm387_vm0, %v5023_v38, %v5024_v30  ;;  %v316_v30 = vunpack.c.h.bf16 %v303_v5 }
 0x2ad   : > { %v4434_v6 = vpack.c.bf16 %v3677_v27, %v3673_v51  ;;  %v5027_v24 = vpop.permute.xlu1 %5026  ;;  %v4424_v50 = vpack.c.bf16 %v3676_v53, %v3672_v23  ;;  %v4432_v55 = vpack.c.bf16 %v3678_v61, %v3674_v7  ;;  %v321_v38 = vunpack.c.l.bf16 %v306_v45  ;;  %v305_v51 = vld [vmem:[%s5161_s29 + $0x30] sm:$0xff] }
 0x2ae   : > { %v5029_v19 = vunpack.i.h.bf16 %v5027_v24  ;;  %v5028_v18 = vunpack.i.l.bf16 %v5027_v24  ;;  %v322_v53 = vunpack.c.h.bf16 %v306_v45 }
 0x2af   : > { %4425 = vmatprep.subr.bf16.mxu0 %v4424_v50  ;;  %4433 = vmatprep.subr.bf16.mxu1 %v4432_v55 }
 0x2b0   : > { %v3671_v57 = vsel %vm387_vm0, %v5028_v18, %v5008_v2  ;;  %v3675_v54 = vsel %vm387_vm0, %v5029_v19, %v5018_v40  ;;  %4435 = vmatpush1.bf16.msra.mxu1 %v4434_v6  ;;  %v319_v18 = vunpack.c.l.bf16 %v305_v51 }
 0x2b1   : > { %v4426_v33 = vpack.c.bf16 %v3675_v54, %v3671_v57 }
 0x2b3   : > { %4427 = vmatpush1.bf16.msra.mxu0 %v4426_v33  ;;  %4283 = vmatmul.mubr.msk.f32.vlgmr.msra.gmra.mrb[0].mxu1 %vm537_vm5, %v4275_v3  ;;  %v320_v33 = vunpack.c.h.bf16 %v305_v51 }
 0x2b4   : > { %3866 = vmatprep.mubr.f32.mxu1 %v5095_v34 }
 0x2b6   : > { %4279 = vmatmul.mubr.msk.f32.vlgmr.msra.gmra.mrb[0].mxu0 %vm537_vm5, %v4275_v3 }
 0x2b7   : > { %4284 = vmatmul.mubr.msk.f32.gmra.mrb[2].mxu1 %vm537_vm5, %v4276_v49  ;;  %3777 = vmatprep.mubr.f32.mxu0 %v5095_v34 }
 0x2b8   : > { %3872 = vmatprep.mubr.f32.mxu1 %v5095_v34 }
 0x2ba   : > { %4280 = vmatmul.mubr.msk.f32.gmra.mrb[2].mxu0 %vm537_vm5, %v4276_v49 }
 0x2bb   : > { %4285 = vmatmul.mubr.msk.f32.gmra.mrb[4].mxu1 %vm537_vm5, %v4277_v10  ;;  %3783 = vmatprep.mubr.f32.mxu0 %v5095_v34 }
 0x2bc   : > { %3878 = vmatprep.mubr.f32.mxu1 %v5095_v34 }
 0x2be   : > { %4281 = vmatmul.mubr.msk.f32.gmra.mrb[4].mxu0 %vm537_vm5, %v4277_v10 }
 0x2bf   : > { %4286 = vmatmul.mubr.msk.f32.gmra.mrb[6].mxu1 %vm537_vm5, %v4278_v48  ;;  %3789 = vmatprep.mubr.f32.mxu0 %v5095_v34  ;;  %v304_v34 = vld [vmem:[%s5161_s29 + $0x28] sm:$0xff] }
 0x2c0   : > { %v317_v42 = vunpack.c.l.bf16 %v304_v34  ;;  %v318_v52 = vunpack.c.h.bf16 %v304_v34 }
 0x2c2   : > { %4282 = vmatmul.mubr.msk.f32.gmra.mrb[6].mxu0 %vm537_vm5, %v4278_v48 }
 0x386   : > { %v3862_v63 = vpop.f32.mrb[0].mxu1 }
 0x387   : > { %v4444_v32 = vadd.f32 %v3862_v63, %v309_v20  ;;  %v3864_v31 = vpop.f32.mrb[1].mxu1 }
 0x388   : > { %v4445_v14 = vadd.f32 %v3864_v31, %v310_v0 }
 0x389   : > { %v3903_v43 = vmax.f32 %v4444_v32, 0.0  ;;  %v3773_v25 = vpop.f32.mrb[0].mxu0 }
 0x38a   : > { %v3904_v47 = vmax.f32 %v4445_v14, 0.0  ;;  %v4436_v39 = vadd.f32 %v3773_v25, %v307_v58  ;;  %v3775_v59 = vpop.f32.mrb[1].mxu0  ;;  %v3868_v36 = vpop.f32.mrb[2].mxu1 }
 0x38b   : > { %3919 = vst [vmem:[%s5353_s24 + $0x18] sm:$0xff] %v3903_v43  ;;  %3935 = vst [vmem:[%s5166_s7 + $0x10] sm:$0xff] %v3903_v43  ;;  %v4437_v26 = vadd.f32 %v3775_v59, %v308_v15  ;;  %v4446_v9 = vadd.f32 %v3868_v36, %v313_v21  ;;  %v3870_v41 = vpop.f32.mrb[3].mxu1 }
 0x38c   : > { %3920 = vst [vmem:[%s5353_s24 + $0x20] sm:$0xff] %v3904_v47  ;;  %3936 = vst [vmem:[%s5166_s7 + $0x18] sm:$0xff] %v3904_v47  ;;  %v3901_v8 = vmax.f32 %v4436_v39, 0.0  ;;  %v4447_v44 = vadd.f32 %v3870_v41, %v314_v29 }
 0x38d   : > { %v3902_v37 = vmax.f32 %v4437_v26, 0.0  ;;  %v3907_v62 = vmax.f32 %v4446_v9, 0.0  ;;  %v3779_v28 = vpop.f32.mrb[2].mxu0 }
 0x38e   : > { %3917 = vst [vmem:[%s5353_s24 + $0x8] sm:$0xff] %v3901_v8  ;;  %3933 = vst [vmem:[%s5166_s7] sm:$0xff] %v3901_v8  ;;  %v3908_v56 = vmax.f32 %v4447_v44, 0.0  ;;  %v4438_v2 = vadd.f32 %v3779_v28, %v311_v13  ;;  %v3781_v11 = vpop.f32.mrb[3].mxu0  ;;  %v3874_v46 = vpop.f32.mrb[4].mxu1 }
 0x38f   : > { %3918 = vst [vmem:[%s5353_s24 + $0x10] sm:$0xff] %v3902_v37  ;;  %3934 = vst [vmem:[%s5166_s7 + $0x8] sm:$0xff] %v3902_v37  ;;  %v4439_v12 = vadd.f32 %v3781_v11, %v312_v16  ;;  %v4448_v60 = vadd.f32 %v3874_v46, %v317_v42  ;;  %v3876_v40 = vpop.f32.mrb[5].mxu1 }
 0x390   : > { %3923 = vst [vmem:[%s5353_s24 + $0x48] sm:$0xff] %v3907_v62  ;;  %3939 = vst [vmem:[%s5166_s7 + $0x30] sm:$0xff] %v3907_v62  ;;  %v3905_v23 = vmax.f32 %v4438_v2, 0.0  ;;  %v4449_v27 = vadd.f32 %v3876_v40, %v318_v52 }
 0x391   : > { %3924 = vst [vmem:[%s5353_s24 + $0x50] sm:$0xff] %v3908_v56  ;;  %3940 = vst [vmem:[%s5166_s7 + $0x38] sm:$0xff] %v3908_v56  ;;  %v3906_v7 = vmax.f32 %v4439_v12, 0.0  ;;  %v3911_v61 = vmax.f32 %v4448_v60, 0.0  ;;  %v3785_v6 = vpop.f32.mrb[4].mxu0 }
 0x392   : > { %3921 = vst [vmem:[%s5353_s24 + $0x38] sm:$0xff] %v3905_v23  ;;  %3937 = vst [vmem:[%s5166_s7 + $0x20] sm:$0xff] %v3905_v23  ;;  %v3912_v24 = vmax.f32 %v4449_v27, 0.0  ;;  %v4440_v50 = vadd.f32 %v3785_v6, %v315_v35  ;;  %v3787_v55 = vpop.f32.mrb[5].mxu0  ;;  %v3880_v19 = vpop.f32.mrb[6].mxu1 }
 0x393   : > { %3922 = vst [vmem:[%s5353_s24 + $0x40] sm:$0xff] %v3906_v7  ;;  %3938 = vst [vmem:[%s5166_s7 + $0x28] sm:$0xff] %v3906_v7  ;;  %v4441_v57 = vadd.f32 %v3787_v55, %v316_v30  ;;  %v4450_v54 = vadd.f32 %v3880_v19, %v321_v38  ;;  %v3882_v3 = vpop.f32.mrb[7].mxu1 }
 0x394   : > { %3927 = vst [vmem:[%s5353_s24 + $0x78] sm:$0xff] %v3911_v61  ;;  %3943 = vst [vmem:[%s5166_s7 + $0x50] sm:$0xff] %v3911_v61  ;;  %v3909_v49 = vmax.f32 %v4440_v50, 0.0  ;;  %v4451_v10 = vadd.f32 %v3882_v3, %v322_v53 }
 0x395   : > { %3928 = vst [vmem:[%s5353_s24 + $0x80] sm:$0xff] %v3912_v24  ;;  %3944 = vst [vmem:[%s5166_s7 + $0x58] sm:$0xff] %v3912_v24  ;;  %v3910_v48 = vmax.f32 %v4441_v57, 0.0  ;;  %v3915_v17 = vmax.f32 %v4450_v54, 0.0  ;;  %v3791_v20 = vpop.f32.mrb[6].mxu0 }
 0x396   : > { %3925 = vst [vmem:[%s5353_s24 + $0x68] sm:$0xff] %v3909_v49  ;;  %3941 = vst [vmem:[%s5166_s7 + $0x40] sm:$0xff] %v3909_v49  ;;  %v3916_v4 = vmax.f32 %v4451_v10, 0.0  ;;  %v4442_v0 = vadd.f32 %v3791_v20, %v319_v18  ;;  %v3793_v22 = vpop.f32.mrb[7].mxu0 }
 0x397   : > { %3926 = vst [vmem:[%s5353_s24 + $0x70] sm:$0xff] %v3910_v48  ;;  %3942 = vst [vmem:[%s5166_s7 + $0x48] sm:$0xff] %v3910_v48  ;;  %v4443_v63 = vadd.f32 %v3793_v22, %v320_v33 }
 0x398   : > { %3931 = vst [vmem:[%s5353_s24 + $0xa8] sm:$0xff] %v3915_v17  ;;  %3947 = vst [vmem:[%s5166_s7 + $0x70] sm:$0xff] %v3915_v17  ;;  %v3913_v58 = vmax.f32 %v4442_v0, 0.0 }
 0x399   : > { %3932 = vst [vmem:[%s5353_s24 + $0xb0] sm:$0xff] %v3916_v4  ;;  %3948 = vst [vmem:[%s5166_s7 + $0x78] sm:$0xff] %v3916_v4  ;;  %v3914_v32 = vmax.f32 %v4443_v63, 0.0 }
 0x39a   : > { %3929 = vst [vmem:[%s5353_s24 + $0x98] sm:$0xff] %v3913_v58  ;;  %3945 = vst [vmem:[%s5166_s7 + $0x60] sm:$0xff] %v3913_v58 }
 0x39b   : > { %3930 = vst [vmem:[%s5353_s24 + $0xa0] sm:$0xff] %v3914_v32  ;;  %3946 = vst [vmem:[%s5166_s7 + $0x68] sm:$0xff] %v3914_v32 }
 0x39c PF: > { %s13_s16 = sadd.s32 1, %s5087_s16   ;;  %s6863_s12 = smov %s5079_s14 }
 0x39d   : > { %p10_p8 = scmp.ge.s32.totalorder %s13_s16, 18   ;;  %s6864_s13 = smov %s5083_s15 }
 0x39e   : > { %s6865_s14 = smov %s6868_s17  ;;  %s6866_s15 = smov %s6872_s18 }
 0x39f   :  { %12 = sbr.rel (!%p10_p8) target bundleno = 3 (0x3), region = 83 }

</bundles_post_ra>
